<compile_context>
chip_gen: v7x
topology: tpu7x:2x2x1
jax: 0.10.0
libtpu: 0.0.40
codegen_flags: <defaults>
</compile_context>

<pallas_src>
import functools

import jax
import jax.numpy as jnp
from jax.experimental import pallas as pl
from jax.experimental.pallas import tpu as pltpu

BN_EPS = 1e-5
LEAKY_SLOPE = 0.1


def _round_up(x, m):
    return (x + m - 1) // m * m


def _make_kernel(Db, kh, kw, Wp, Lout, inv_count):
    """Build the per-grid-step kernel.

    Per grid step (Db depth slices):
      x_ref    : (Db, C, Lin)       zero-padded input, (n, h, w) flattened on lanes
      w_ref    : (kh*kw, Cout, C)   conv weight, one (Cout, C) matrix per tap
      mask_ref : (1, Lout)          1.0 at valid output positions, 0.0 elsewhere
      o_ref    : (Db, Cout, Lout)   normalized + activated output (dense frame)
    """

    def kernel(x_ref, w_ref, mask_ref, o_ref):
        mask = mask_ref[...]                                   # (1, Lout)
        cout = w_ref.shape[1]
        for d in range(Db):                                    # static unroll
            # Conv-as-matmul: tap (i, j) of output position q is input element
            # q + i*Wp + j in the flattened padded frame, i.e. a lane-shifted
            # window of the same slab.  Accumulate kh*kw (Cout, C) @ (C, Lout)
            # MXU matmuls in f32.
            acc = jnp.zeros((cout, Lout), dtype=jnp.float32)
            for i in range(kh):
                for j in range(kw):
                    s = i * Wp + j
                    xt = x_ref[d, :, s:s + Lout]               # (C, Lout)
                    acc = acc + jnp.dot(w_ref[i * kw + j], xt,
                                        preferred_element_type=jnp.float32)
            # NOTE: conv bias is intentionally omitted -- it is cancelled
            # exactly by the mean subtraction of BatchNorm2d(affine=False).
            #
            # BatchNorm2d training semantics: per depth slice, per output
            # channel, biased stats over the valid (N, Ho, Wo) positions only
            # (pad / out-of-window lanes are masked out of the sums).
            mean = jnp.sum(acc * mask, axis=1, keepdims=True) * inv_count
            diff = acc - mean
            var = jnp.sum(diff * diff * mask, axis=1, keepdims=True) * inv_count
            yn = diff * jax.lax.rsqrt(var + BN_EPS)            # rsqrt -> EUP
            act = jnp.where(yn >= 0, yn, LEAKY_SLOPE * yn)
            o_ref[d] = act.astype(o_ref.dtype)

    return kernel


@functools.partial(jax.jit, static_argnames=("kernel_size", "stride", "padding"))
def nn3d_by_2d(x, weight, bias, *, kernel_size, stride, padding):
    """Forward pass of NN3Dby2D (Conv2d path, bn=True, LeakyReLU(0.1)).

    x      : (N, C, D, H, W) float32
    weight : (Cout, Cin, kh, kw) float32   (PyTorch Conv2d layout)
    bias   : (Cout,) float32 (accepted for API parity; cancelled by the BN)
    returns: (N, Cout, D, Ho, Wo) float32
    """
    del bias  # cancelled exactly by BatchNorm2d(affine=False) mean subtraction
    N, C, D, H, W = x.shape
    Cout, Cin, kh, kw = weight.shape
    assert Cin == C and kh == kernel_size and kw == kernel_size

    Hp, Wp = H + 2 * padding, W + 2 * padding
    Ho = (Hp - kh) // stride + 1
    Wo = (Wp - kw) // stride + 1
    L = N * Hp * Wp                       # dense (stride-1) flattened frame
    Lout = _round_up(L, 128)              # lane-dense output width
    s_max = (kh - 1) * Wp + (kw - 1)      # largest tap shift
    Lin = _round_up(Lout + s_max, 128)

    # ---- JAX glue: single-pass pad + flatten (no kh*kw im2col blow-up) -----
    xpad = jnp.pad(x, ((0, 0), (0, 0), (0, 0),
                       (padding, padding), (padding, padding)))
    xflat = jnp.transpose(xpad, (2, 1, 0, 3, 4)).reshape(D, C, L)
    xflat = jnp.pad(xflat, ((0, 0), (0, 0), (0, Lin - L)))

    # Conv taps as (kh*kw, Cout, Cin) matrices.
    wt = jnp.transpose(weight, (2, 3, 0, 1)).reshape(kh * kw, Cout, Cin)

    # Valid-output mask in the dense padded frame (handles stride by marking
    # only the strided output grid; kernel computes densely, wrapper subsamples).
    # TODO(synk): stride > 1 computes stride^2 extra lanes; acceptable here (stride=1).
    h_ok = (jnp.arange(Hp) % stride == 0) & (jnp.arange(Hp) < Ho * stride)
    w_ok = (jnp.arange(Wp) % stride == 0) & (jnp.arange(Wp) < Wo * stride)
    mask2d = (h_ok[:, None] & w_ok[None, :]).astype(jnp.float32)
    mask = jnp.broadcast_to(mask2d[None], (N, Hp, Wp)).reshape(L)
    mask = jnp.pad(mask, (0, Lout - L)).reshape(1, Lout)

    # Batch depth slices per grid step, but keep >= 2 grid points (v7x megacore).
    Db = 2 if (D % 2 == 0 and D >= 4) else 1
    grid = (D // Db,)

    kernel = _make_kernel(Db, kh, kw, Wp, Lout, 1.0 / float(N * Ho * Wo))

    # TODO(synk): for very large N*H*W, tile the flattened M axis with a
    # two-pass BN (sum / sum-of-squares scratch) instead of one block per slice.
    out_flat = pl.pallas_call(
        kernel,
        out_shape=jax.ShapeDtypeStruct((D, Cout, Lout), jnp.float32),
        grid=grid,
        in_specs=[
            pl.BlockSpec((Db, C, Lin), lambda g: (g, 0, 0)),
            pl.BlockSpec((kh * kw, Cout, Cin), lambda g: (0, 0, 0)),
            pl.BlockSpec((1, Lout), lambda g: (0, 0)),
        ],
        out_specs=pl.BlockSpec((Db, Cout, Lout), lambda g: (g, 0, 0)),
        compiler_params=pltpu.CompilerParams(
            dimension_semantics=("parallel",)),
    )(xflat, wt, mask)

    # ---- back to PyTorch (N, Cout, D, Ho, Wo) layout ------------------------
    out = out_flat[:, :, :L].reshape(D, Cout, N, Hp, Wp)
    out = out[:, :, :, ::stride, ::stride][:, :, :, :Ho, :Wo]
    return jnp.transpose(out, (2, 1, 0, 3, 4))


# TODO(synk): ConvTranspose2d (upsample=True), bn=False and non-LeakyReLU
# activation variants of NN3Dby2D are not implemented here.


def _reference(x, weight, bias, *, kernel_size, stride, padding):
    """Pure-JAX reference (per-slice conv + training-mode BN + LeakyReLU)."""
    N, C, D, H, W = x.shape
    outs = []
    for d in range(D):
        xd = x[:, :, d]                                            # (N, C, H, W)
        y = jax.lax.conv_general_dilated(
            xd, weight, window_strides=(stride, stride),
            padding=[(padding, padding), (padding, padding)],
            dimension_numbers=("NCHW", "OIHW", "NCHW"))
        y = y + bias.reshape(1, -1, 1, 1)
        mean = jnp.mean(y, axis=(0, 2, 3), keepdims=True)
        var = jnp.mean((y - mean) ** 2, axis=(0, 2, 3), keepdims=True)
        yn = (y - mean) / jnp.sqrt(var + BN_EPS)
        outs.append(yn)
    out = jnp.stack(outs, axis=2)                                  # (N, Cout, D, Ho, Wo)
    return jnp.where(out >= 0, out, LEAKY_SLOPE * out)


if __name__ == "__main__":
    # NN3Dby2D(in=4, out=8, kernel_size=3, stride=1, padding=1,
    #          activation=LeakyReLU(0.1), bn=True)
    N, Cin, D, H, W = 2, 4, 4, 16, 16
    Cout, ksize, stride, padding = 8, 3, 1, 1

    key = jax.random.PRNGKey(0)
    kx, kw_, kb = jax.random.split(key, 3)
    x = jax.random.normal(kx, (N, Cin, D, H, W), dtype=jnp.float32)
    fan_in = Cin * ksize * ksize
    bound = 1.0 / (fan_in ** 0.5)
    weight = jax.random.uniform(kw_, (Cout, Cin, ksize, ksize),
                                minval=-bound, maxval=bound, dtype=jnp.float32)
    bias = jax.random.uniform(kb, (Cout,), minval=-bound, maxval=bound,
                              dtype=jnp.float32)

    out = nn3d_by_2d(x, weight, bias, kernel_size=ksize, stride=stride,
                     padding=padding)
    out = jax.block_until_ready(out)

    ref = _reference(x, weight, bias, kernel_size=ksize, stride=stride,
                     padding=padding)
    assert out.shape == (N, Cout, D, H, W), out.shape
    assert jnp.allclose(out, ref, atol=1e-4, rtol=1e-4), float(
        jnp.max(jnp.abs(out - ref)))

    print("KERNEL_OK")
</pallas_src>

<mosaic_0001>
module attributes {stable_mosaic.version = 11 : i64} {
  func.func @kernel(%arg0: i32, %arg1: memref<2x4x896xf32, #tpu.memory_space<vmem>>, %arg2: memref<9x8x4xf32, #tpu.memory_space<vmem>>, %arg3: memref<1x768xf32, #tpu.memory_space<vmem>>, %arg4: memref<2x8x768xf32, #tpu.memory_space<vmem>>) attributes {dimension_semantics = [#tpu.dimension_semantics<parallel>], iteration_bounds = array<i64: 2>, scalar_prefetch = 0 : i64, scratch_operands = 0 : i64, tpu.core_type = #tpu.core_type<tc>, window_params = [{transform_indices = @transform_0, window_bounds = array<i64: 2, 4, 896>}, {pipeline_mode = #tpu.pipeline_mode<synchronous>, transform_indices = @transform_1, window_bounds = array<i64: 9, 8, 4>}, {pipeline_mode = #tpu.pipeline_mode<synchronous>, transform_indices = @transform_2, window_bounds = array<i64: 1, 768>}, {transform_indices = @transform_3, window_bounds = array<i64: 2, 8, 768>}]} {
    %c0 = arith.constant 0 : index
    %c0_0 = arith.constant 0 : index
    %0 = vector.load %arg3[%c0, %c0_0] : memref<1x768xf32, #tpu.memory_space<vmem>>, vector<1x768xf32>
    %cst = arith.constant 0.000000e+00 : f32
    %1 = vector.broadcast %cst : f32 to vector<8x768xf32>
    %c0_1 = arith.constant 0 : index
    %c0_2 = arith.constant 0 : index
    %c0_3 = arith.constant 0 : index
    %2 = vector.load %arg1[%c0_1, %c0_2, %c0_3] : memref<2x4x896xf32, #tpu.memory_space<vmem>>, vector<1x4x768xf32>
    %3 = vector.shape_cast %2 : vector<1x4x768xf32> to vector<4x768xf32>
    %c0_4 = arith.constant 0 : index
    %c0_5 = arith.constant 0 : index
    %c0_6 = arith.constant 0 : index
    %4 = vector.load %arg2[%c0_4, %c0_5, %c0_6] : memref<9x8x4xf32, #tpu.memory_space<vmem>>, vector<1x8x4xf32>
    %5 = vector.shape_cast %4 : vector<1x8x4xf32> to vector<8x4xf32>
    %cst_7 = arith.constant dense<0.000000e+00> : vector<8x768xf32>
    %6 = tpu.matmul %5, %3, %cst_7 {dimension_numbers = #tpu.dot_dimension_numbers<[1], [0], [0], [1], [0, 0, 1, 1], [], []>} : vector<8x4xf32>, vector<4x768xf32>, vector<8x768xf32> -> vector<8x768xf32>
    %7 = arith.addf %1, %6 : vector<8x768xf32>
    %c0_8 = arith.constant 0 : index
    %c0_9 = arith.constant 0 : index
    %c1 = arith.constant 1 : index
    %8 = vector.load %arg1[%c0_8, %c0_9, %c1] : memref<2x4x896xf32, #tpu.memory_space<vmem>>, vector<1x4x768xf32>
    %9 = vector.shape_cast %8 : vector<1x4x768xf32> to vector<4x768xf32>
    %c1_10 = arith.constant 1 : index
    %c0_11 = arith.constant 0 : index
    %c0_12 = arith.constant 0 : index
    %10 = vector.load %arg2[%c1_10, %c0_11, %c0_12] : memref<9x8x4xf32, #tpu.memory_space<vmem>>, vector<1x8x4xf32>
    %11 = vector.shape_cast %10 : vector<1x8x4xf32> to vector<8x4xf32>
    %cst_13 = arith.constant dense<0.000000e+00> : vector<8x768xf32>
    %12 = tpu.matmul %11, %9, %cst_13 {dimension_numbers = #tpu.dot_dimension_numbers<[1], [0], [0], [1], [0, 0, 1, 1], [], []>} : vector<8x4xf32>, vector<4x768xf32>, vector<8x768xf32> -> vector<8x768xf32>
    %13 = arith.addf %7, %12 : vector<8x768xf32>
    %c0_14 = arith.constant 0 : index
    %c0_15 = arith.constant 0 : index
    %c2 = arith.constant 2 : index
    %14 = vector.load %arg1[%c0_14, %c0_15, %c2] : memref<2x4x896xf32, #tpu.memory_space<vmem>>, vector<1x4x768xf32>
    %15 = vector.shape_cast %14 : vector<1x4x768xf32> to vector<4x768xf32>
    %c2_16 = arith.constant 2 : index
    %c0_17 = arith.constant 0 : index
    %c0_18 = arith.constant 0 : index
    %16 = vector.load %arg2[%c2_16, %c0_17, %c0_18] : memref<9x8x4xf32, #tpu.memory_space<vmem>>, vector<1x8x4xf32>
    %17 = vector.shape_cast %16 : vector<1x8x4xf32> to vector<8x4xf32>
    %cst_19 = arith.constant dense<0.000000e+00> : vector<8x768xf32>
    %18 = tpu.matmul %17, %15, %cst_19 {dimension_numbers = #tpu.dot_dimension_numbers<[1], [0], [0], [1], [0, 0, 1, 1], [], []>} : vector<8x4xf32>, vector<4x768xf32>, vector<8x768xf32> -> vector<8x768xf32>
    %19 = arith.addf %13, %18 : vector<8x768xf32>
    %c0_20 = arith.constant 0 : index
    %c0_21 = arith.constant 0 : index
    %c18 = arith.constant 18 : index
    %20 = vector.load %arg1[%c0_20, %c0_21, %c18] : memref<2x4x896xf32, #tpu.memory_space<vmem>>, vector<1x4x768xf32>
    %21 = vector.shape_cast %20 : vector<1x4x768xf32> to vector<4x768xf32>
    %c3 = arith.constant 3 : index
    %c0_22 = arith.constant 0 : index
    %c0_23 = arith.constant 0 : index
    %22 = vector.load %arg2[%c3, %c0_22, %c0_23] : memref<9x8x4xf32, #tpu.memory_space<vmem>>, vector<1x8x4xf32>
    %23 = vector.shape_cast %22 : vector<1x8x4xf32> to vector<8x4xf32>
    %cst_24 = arith.constant dense<0.000000e+00> : vector<8x768xf32>
    %24 = tpu.matmul %23, %21, %cst_24 {dimension_numbers = #tpu.dot_dimension_numbers<[1], [0], [0], [1], [0, 0, 1, 1], [], []>} : vector<8x4xf32>, vector<4x768xf32>, vector<8x768xf32> -> vector<8x768xf32>
    %25 = arith.addf %19, %24 : vector<8x768xf32>
    %c0_25 = arith.constant 0 : index
    %c0_26 = arith.constant 0 : index
    %c19 = arith.constant 19 : index
    %26 = vector.load %arg1[%c0_25, %c0_26, %c19] : memref<2x4x896xf32, #tpu.memory_space<vmem>>, vector<1x4x768xf32>
    %27 = vector.shape_cast %26 : vector<1x4x768xf32> to vector<4x768xf32>
    %c4 = arith.constant 4 : index
    %c0_27 = arith.constant 0 : index
    %c0_28 = arith.constant 0 : index
    %28 = vector.load %arg2[%c4, %c0_27, %c0_28] : memref<9x8x4xf32, #tpu.memory_space<vmem>>, vector<1x8x4xf32>
    %29 = vector.shape_cast %28 : vector<1x8x4xf32> to vector<8x4xf32>
    %cst_29 = arith.constant dense<0.000000e+00> : vector<8x768xf32>
    %30 = tpu.matmul %29, %27, %cst_29 {dimension_numbers = #tpu.dot_dimension_numbers<[1], [0], [0], [1], [0, 0, 1, 1], [], []>} : vector<8x4xf32>, vector<4x768xf32>, vector<8x768xf32> -> vector<8x768xf32>
    %31 = arith.addf %25, %30 : vector<8x768xf32>
    %c0_30 = arith.constant 0 : index
    %c0_31 = arith.constant 0 : index
    %c20 = arith.constant 20 : index
    %32 = vector.load %arg1[%c0_30, %c0_31, %c20] : memref<2x4x896xf32, #tpu.memory_space<vmem>>, vector<1x4x768xf32>
    %33 = vector.shape_cast %32 : vector<1x4x768xf32> to vector<4x768xf32>
    %c5 = arith.constant 5 : index
    %c0_32 = arith.constant 0 : index
    %c0_33 = arith.constant 0 : index
    %34 = vector.load %arg2[%c5, %c0_32, %c0_33] : memref<9x8x4xf32, #tpu.memory_space<vmem>>, vector<1x8x4xf32>
    %35 = vector.shape_cast %34 : vector<1x8x4xf32> to vector<8x4xf32>
    %cst_34 = arith.constant dense<0.000000e+00> : vector<8x768xf32>
    %36 = tpu.matmul %35, %33, %cst_34 {dimension_numbers = #tpu.dot_dimension_numbers<[1], [0], [0], [1], [0, 0, 1, 1], [], []>} : vector<8x4xf32>, vector<4x768xf32>, vector<8x768xf32> -> vector<8x768xf32>
    %37 = arith.addf %31, %36 : vector<8x768xf32>
    %c0_35 = arith.constant 0 : index
    %c0_36 = arith.constant 0 : index
    %c36 = arith.constant 36 : index
    %38 = vector.load %arg1[%c0_35, %c0_36, %c36] : memref<2x4x896xf32, #tpu.memory_space<vmem>>, vector<1x4x768xf32>
    %39 = vector.shape_cast %38 : vector<1x4x768xf32> to vector<4x768xf32>
    %c6 = arith.constant 6 : index
    %c0_37 = arith.constant 0 : index
    %c0_38 = arith.constant 0 : index
    %40 = vector.load %arg2[%c6, %c0_37, %c0_38] : memref<9x8x4xf32, #tpu.memory_space<vmem>>, vector<1x8x4xf32>
    %41 = vector.shape_cast %40 : vector<1x8x4xf32> to vector<8x4xf32>
    %cst_39 = arith.constant dense<0.000000e+00> : vector<8x768xf32>
    %42 = tpu.matmul %41, %39, %cst_39 {dimension_numbers = #tpu.dot_dimension_numbers<[1], [0], [0], [1], [0, 0, 1, 1], [], []>} : vector<8x4xf32>, vector<4x768xf32>, vector<8x768xf32> -> vector<8x768xf32>
    %43 = arith.addf %37, %42 : vector<8x768xf32>
    %c0_40 = arith.constant 0 : index
    %c0_41 = arith.constant 0 : index
    %c37 = arith.constant 37 : index
    %44 = vector.load %arg1[%c0_40, %c0_41, %c37] : memref<2x4x896xf32, #tpu.memory_space<vmem>>, vector<1x4x768xf32>
    %45 = vector.shape_cast %44 : vector<1x4x768xf32> to vector<4x768xf32>
    %c7 = arith.constant 7 : index
    %c0_42 = arith.constant 0 : index
    %c0_43 = arith.constant 0 : index
    %46 = vector.load %arg2[%c7, %c0_42, %c0_43] : memref<9x8x4xf32, #tpu.memory_space<vmem>>, vector<1x8x4xf32>
    %47 = vector.shape_cast %46 : vector<1x8x4xf32> to vector<8x4xf32>
    %cst_44 = arith.constant dense<0.000000e+00> : vector<8x768xf32>
    %48 = tpu.matmul %47, %45, %cst_44 {dimension_numbers = #tpu.dot_dimension_numbers<[1], [0], [0], [1], [0, 0, 1, 1], [], []>} : vector<8x4xf32>, vector<4x768xf32>, vector<8x768xf32> -> vector<8x768xf32>
    %49 = arith.addf %43, %48 : vector<8x768xf32>
    %c0_45 = arith.constant 0 : index
    %c0_46 = arith.constant 0 : index
    %c38 = arith.constant 38 : index
    %50 = vector.load %arg1[%c0_45, %c0_46, %c38] : memref<2x4x896xf32, #tpu.memory_space<vmem>>, vector<1x4x768xf32>
    %51 = vector.shape_cast %50 : vector<1x4x768xf32> to vector<4x768xf32>
    %c8 = arith.constant 8 : index
    %c0_47 = arith.constant 0 : index
    %c0_48 = arith.constant 0 : index
    %52 = vector.load %arg2[%c8, %c0_47, %c0_48] : memref<9x8x4xf32, #tpu.memory_space<vmem>>, vector<1x8x4xf32>
    %53 = vector.shape_cast %52 : vector<1x8x4xf32> to vector<8x4xf32>
    %cst_49 = arith.constant dense<0.000000e+00> : vector<8x768xf32>
    %54 = tpu.matmul %53, %51, %cst_49 {dimension_numbers = #tpu.dot_dimension_numbers<[1], [0], [0], [1], [0, 0, 1, 1], [], []>} : vector<8x4xf32>, vector<4x768xf32>, vector<8x768xf32> -> vector<8x768xf32>
    %55 = arith.addf %49, %54 : vector<8x768xf32>
    %56 = vector.broadcast %0 : vector<1x768xf32> to vector<8x768xf32>
    %57 = arith.mulf %55, %56 : vector<8x768xf32>
    %cst_50 = arith.constant dense<0.000000e+00> : vector<8xf32>
    %58 = vector.multi_reduction <add>, %57, %cst_50 [1] : vector<8x768xf32> to vector<8xf32>
    %59 = vector.shape_cast %58 : vector<8xf32> to vector<8x1xf32>
    %cst_51 = arith.constant 0.001953125 : f32
    %60 = vector.broadcast %cst_51 : f32 to vector<8x1xf32>
    %61 = arith.mulf %59, %60 : vector<8x1xf32>
    %62 = vector.broadcast %61 : vector<8x1xf32> to vector<8x768xf32>
    %63 = arith.subf %55, %62 : vector<8x768xf32>
    %64 = arith.mulf %63, %63 : vector<8x768xf32>
    %65 = vector.broadcast %0 : vector<1x768xf32> to vector<8x768xf32>
    %66 = arith.mulf %64, %65 : vector<8x768xf32>
    %cst_52 = arith.constant dense<0.000000e+00> : vector<8xf32>
    %67 = vector.multi_reduction <add>, %66, %cst_52 [1] : vector<8x768xf32> to vector<8xf32>
    %68 = vector.shape_cast %67 : vector<8xf32> to vector<8x1xf32>
    %cst_53 = arith.constant 0.001953125 : f32
    %69 = vector.broadcast %cst_53 : f32 to vector<8x1xf32>
    %70 = arith.mulf %68, %69 : vector<8x1xf32>
    %cst_54 = arith.constant 9.99999974E-6 : f32
    %71 = vector.broadcast %cst_54 : f32 to vector<8x1xf32>
    %72 = arith.addf %70, %71 : vector<8x1xf32>
    %73 = math.rsqrt %72 : vector<8x1xf32>
    %74 = vector.broadcast %73 : vector<8x1xf32> to vector<8x768xf32>
    %75 = arith.mulf %63, %74 : vector<8x768xf32>
    %cst_55 = arith.constant 0.000000e+00 : f32
    %76 = vector.broadcast %cst_55 : f32 to vector<8x768xf32>
    %77 = arith.cmpf oge, %75, %76 : vector<8x768xf32>
    %cst_56 = arith.constant 1.000000e-01 : f32
    %78 = vector.broadcast %cst_56 : f32 to vector<8x768xf32>
    %79 = arith.mulf %78, %75 : vector<8x768xf32>
    %80 = arith.select %77, %75, %79 : vector<8x768xi1>, vector<8x768xf32>
    %c0_57 = arith.constant 0 : index
    %c0_58 = arith.constant 0 : index
    %c0_59 = arith.constant 0 : index
    %81 = vector.load %arg4[%c0_57, %c0_58, %c0_59] : memref<2x8x768xf32, #tpu.memory_space<vmem>>, vector<1x8x768xf32>
    %82 = vector.shape_cast %81 : vector<1x8x768xf32> to vector<8x768xf32>
    %83 = vector.shape_cast %80 : vector<8x768xf32> to vector<1x8x768xf32>
    tpu.vector_store %arg4[%c0_57, %c0_58, %c0_59], %83 {strides = array<i32>} : memref<2x8x768xf32, #tpu.memory_space<vmem>>, vector<1x8x768xf32>,
    %cst_60 = arith.constant 0.000000e+00 : f32
    %84 = vector.broadcast %cst_60 : f32 to vector<8x768xf32>
    %c1_61 = arith.constant 1 : index
    %c0_62 = arith.constant 0 : index
    %c0_63 = arith.constant 0 : index
    %85 = vector.load %arg1[%c1_61, %c0_62, %c0_63] : memref<2x4x896xf32, #tpu.memory_space<vmem>>, vector<1x4x768xf32>
    %86 = vector.shape_cast %85 : vector<1x4x768xf32> to vector<4x768xf32>
    %c0_64 = arith.constant 0 : index
    %c0_65 = arith.constant 0 : index
    %c0_66 = arith.constant 0 : index
    %87 = vector.load %arg2[%c0_64, %c0_65, %c0_66] : memref<9x8x4xf32, #tpu.memory_space<vmem>>, vector<1x8x4xf32>
    %88 = vector.shape_cast %87 : vector<1x8x4xf32> to vector<8x4xf32>
    %cst_67 = arith.constant dense<0.000000e+00> : vector<8x768xf32>
    %89 = tpu.matmul %88, %86, %cst_67 {dimension_numbers = #tpu.dot_dimension_numbers<[1], [0], [0], [1], [0, 0, 1, 1], [], []>} : vector<8x4xf32>, vector<4x768xf32>, vector<8x768xf32> -> vector<8x768xf32>
    %90 = arith.addf %84, %89 : vector<8x768xf32>
    %c1_68 = arith.constant 1 : index
    %c0_69 = arith.constant 0 : index
    %c1_70 = arith.constant 1 : index
    %91 = vector.load %arg1[%c1_68, %c0_69, %c1_70] : memref<2x4x896xf32, #tpu.memory_space<vmem>>, vector<1x4x768xf32>
    %92 = vector.shape_cast %91 : vector<1x4x768xf32> to vector<4x768xf32>
    %c1_71 = arith.constant 1 : index
    %c0_72 = arith.constant 0 : index
    %c0_73 = arith.constant 0 : index
    %93 = vector.load %arg2[%c1_71, %c0_72, %c0_73] : memref<9x8x4xf32, #tpu.memory_space<vmem>>, vector<1x8x4xf32>
    %94 = vector.shape_cast %93 : vector<1x8x4xf32> to vector<8x4xf32>
    %cst_74 = arith.constant dense<0.000000e+00> : vector<8x768xf32>
    %95 = tpu.matmul %94, %92, %cst_74 {dimension_numbers = #tpu.dot_dimension_numbers<[1], [0], [0], [1], [0, 0, 1, 1], [], []>} : vector<8x4xf32>, vector<4x768xf32>, vector<8x768xf32> -> vector<8x768xf32>
    %96 = arith.addf %90, %95 : vector<8x768xf32>
    %c1_75 = arith.constant 1 : index
    %c0_76 = arith.constant 0 : index
    %c2_77 = arith.constant 2 : index
    %97 = vector.load %arg1[%c1_75, %c0_76, %c2_77] : memref<2x4x896xf32, #tpu.memory_space<vmem>>, vector<1x4x768xf32>
    %98 = vector.shape_cast %97 : vector<1x4x768xf32> to vector<4x768xf32>
    %c2_78 = arith.constant 2 : index
    %c0_79 = arith.constant 0 : index
    %c0_80 = arith.constant 0 : index
    %99 = vector.load %arg2[%c2_78, %c0_79, %c0_80] : memref<9x8x4xf32, #tpu.memory_space<vmem>>, vector<1x8x4xf32>
    %100 = vector.shape_cast %99 : vector<1x8x4xf32> to vector<8x4xf32>
    %cst_81 = arith.constant dense<0.000000e+00> : vector<8x768xf32>
    %101 = tpu.matmul %100, %98, %cst_81 {dimension_numbers = #tpu.dot_dimension_numbers<[1], [0], [0], [1], [0, 0, 1, 1], [], []>} : vector<8x4xf32>, vector<4x768xf32>, vector<8x768xf32> -> vector<8x768xf32>
    %102 = arith.addf %96, %101 : vector<8x768xf32>
    %c1_82 = arith.constant 1 : index
    %c0_83 = arith.constant 0 : index
    %c18_84 = arith.constant 18 : index
    %103 = vector.load %arg1[%c1_82, %c0_83, %c18_84] : memref<2x4x896xf32, #tpu.memory_space<vmem>>, vector<1x4x768xf32>
    %104 = vector.shape_cast %103 : vector<1x4x768xf32> to vector<4x768xf32>
    %c3_85 = arith.constant 3 : index
    %c0_86 = arith.constant 0 : index
    %c0_87 = arith.constant 0 : index
    %105 = vector.load %arg2[%c3_85, %c0_86, %c0_87] : memref<9x8x4xf32, #tpu.memory_space<vmem>>, vector<1x8x4xf32>
    %106 = vector.shape_cast %105 : vector<1x8x4xf32> to vector<8x4xf32>
    %cst_88 = arith.constant dense<0.000000e+00> : vector<8x768xf32>
    %107 = tpu.matmul %106, %104, %cst_88 {dimension_numbers = #tpu.dot_dimension_numbers<[1], [0], [0], [1], [0, 0, 1, 1], [], []>} : vector<8x4xf32>, vector<4x768xf32>, vector<8x768xf32> -> vector<8x768xf32>
    %108 = arith.addf %102, %107 : vector<8x768xf32>
    %c1_89 = arith.constant 1 : index
    %c0_90 = arith.constant 0 : index
    %c19_91 = arith.constant 19 : index
    %109 = vector.load %arg1[%c1_89, %c0_90, %c19_91] : memref<2x4x896xf32, #tpu.memory_space<vmem>>, vector<1x4x768xf32>
    %110 = vector.shape_cast %109 : vector<1x4x768xf32> to vector<4x768xf32>
    %c4_92 = arith.constant 4 : index
    %c0_93 = arith.constant 0 : index
    %c0_94 = arith.constant 0 : index
    %111 = vector.load %arg2[%c4_92, %c0_93, %c0_94] : memref<9x8x4xf32, #tpu.memory_space<vmem>>, vector<1x8x4xf32>
    %112 = vector.shape_cast %111 : vector<1x8x4xf32> to vector<8x4xf32>
    %cst_95 = arith.constant dense<0.000000e+00> : vector<8x768xf32>
    %113 = tpu.matmul %112, %110, %cst_95 {dimension_numbers = #tpu.dot_dimension_numbers<[1], [0], [0], [1], [0, 0, 1, 1], [], []>} : vector<8x4xf32>, vector<4x768xf32>, vector<8x768xf32> -> vector<8x768xf32>
    %114 = arith.addf %108, %113 : vector<8x768xf32>
    %c1_96 = arith.constant 1 : index
    %c0_97 = arith.constant 0 : index
    %c20_98 = arith.constant 20 : index
    %115 = vector.load %arg1[%c1_96, %c0_97, %c20_98] : memref<2x4x896xf32, #tpu.memory_space<vmem>>, vector<1x4x768xf32>
    %116 = vector.shape_cast %115 : vector<1x4x768xf32> to vector<4x768xf32>
    %c5_99 = arith.constant 5 : index
    %c0_100 = arith.constant 0 : index
    %c0_101 = arith.constant 0 : index
    %117 = vector.load %arg2[%c5_99, %c0_100, %c0_101] : memref<9x8x4xf32, #tpu.memory_space<vmem>>, vector<1x8x4xf32>
    %118 = vector.shape_cast %117 : vector<1x8x4xf32> to vector<8x4xf32>
    %cst_102 = arith.constant dense<0.000000e+00> : vector<8x768xf32>
    %119 = tpu.matmul %118, %116, %cst_102 {dimension_numbers = #tpu.dot_dimension_numbers<[1], [0], [0], [1], [0, 0, 1, 1], [], []>} : vector<8x4xf32>, vector<4x768xf32>, vector<8x768xf32> -> vector<8x768xf32>
    %120 = arith.addf %114, %119 : vector<8x768xf32>
    %c1_103 = arith.constant 1 : index
    %c0_104 = arith.constant 0 : index
    %c36_105 = arith.constant 36 : index
    %121 = vector.load %arg1[%c1_103, %c0_104, %c36_105] : memref<2x4x896xf32, #tpu.memory_space<vmem>>, vector<1x4x768xf32>
    %122 = vector.shape_cast %121 : vector<1x4x768xf32> to vector<4x768xf32>
    %c6_106 = arith.constant 6 : index
    %c0_107 = arith.constant 0 : index
    %c0_108 = arith.constant 0 : index
    %123 = vector.load %arg2[%c6_106, %c0_107, %c0_108] : memref<9x8x4xf32, #tpu.memory_space<vmem>>, vector<1x8x4xf32>
    %124 = vector.shape_cast %123 : vector<1x8x4xf32> to vector<8x4xf32>
    %cst_109 = arith.constant dense<0.000000e+00> : vector<8x768xf32>
    %125 = tpu.matmul %124, %122, %cst_109 {dimension_numbers = #tpu.dot_dimension_numbers<[1], [0], [0], [1], [0, 0, 1, 1], [], []>} : vector<8x4xf32>, vector<4x768xf32>, vector<8x768xf32> -> vector<8x768xf32>
    %126 = arith.addf %120, %125 : vector<8x768xf32>
    %c1_110 = arith.constant 1 : index
    %c0_111 = arith.constant 0 : index
    %c37_112 = arith.constant 37 : index
    %127 = vector.load %arg1[%c1_110, %c0_111, %c37_112] : memref<2x4x896xf32, #tpu.memory_space<vmem>>, vector<1x4x768xf32>
    %128 = vector.shape_cast %127 : vector<1x4x768xf32> to vector<4x768xf32>
    %c7_113 = arith.constant 7 : index
    %c0_114 = arith.constant 0 : index
    %c0_115 = arith.constant 0 : index
    %129 = vector.load %arg2[%c7_113, %c0_114, %c0_115] : memref<9x8x4xf32, #tpu.memory_space<vmem>>, vector<1x8x4xf32>
    %130 = vector.shape_cast %129 : vector<1x8x4xf32> to vector<8x4xf32>
    %cst_116 = arith.constant dense<0.000000e+00> : vector<8x768xf32>
    %131 = tpu.matmul %130, %128, %cst_116 {dimension_numbers = #tpu.dot_dimension_numbers<[1], [0], [0], [1], [0, 0, 1, 1], [], []>} : vector<8x4xf32>, vector<4x768xf32>, vector<8x768xf32> -> vector<8x768xf32>
    %132 = arith.addf %126, %131 : vector<8x768xf32>
    %c1_117 = arith.constant 1 : index
    %c0_118 = arith.constant 0 : index
    %c38_119 = arith.constant 38 : index
    %133 = vector.load %arg1[%c1_117, %c0_118, %c38_119] : memref<2x4x896xf32, #tpu.memory_space<vmem>>, vector<1x4x768xf32>
    %134 = vector.shape_cast %133 : vector<1x4x768xf32> to vector<4x768xf32>
    %c8_120 = arith.constant 8 : index
    %c0_121 = arith.constant 0 : index
    %c0_122 = arith.constant 0 : index
    %135 = vector.load %arg2[%c8_120, %c0_121, %c0_122] : memref<9x8x4xf32, #tpu.memory_space<vmem>>, vector<1x8x4xf32>
    %136 = vector.shape_cast %135 : vector<1x8x4xf32> to vector<8x4xf32>
    %cst_123 = arith.constant dense<0.000000e+00> : vector<8x768xf32>
    %137 = tpu.matmul %136, %134, %cst_123 {dimension_numbers = #tpu.dot_dimension_numbers<[1], [0], [0], [1], [0, 0, 1, 1], [], []>} : vector<8x4xf32>, vector<4x768xf32>, vector<8x768xf32> -> vector<8x768xf32>
    %138 = arith.addf %132, %137 : vector<8x768xf32>
    %139 = vector.broadcast %0 : vector<1x768xf32> to vector<8x768xf32>
    %140 = arith.mulf %138, %139 : vector<8x768xf32>
    %cst_124 = arith.constant dense<0.000000e+00> : vector<8xf32>
    %141 = vector.multi_reduction <add>, %140, %cst_124 [1] : vector<8x768xf32> to vector<8xf32>
    %142 = vector.shape_cast %141 : vector<8xf32> to vector<8x1xf32>
    %cst_125 = arith.constant 0.001953125 : f32
    %143 = vector.broadcast %cst_125 : f32 to vector<8x1xf32>
    %144 = arith.mulf %142, %143 : vector<8x1xf32>
    %145 = vector.broadcast %144 : vector<8x1xf32> to vector<8x768xf32>
    %146 = arith.subf %138, %145 : vector<8x768xf32>
    %147 = arith.mulf %146, %146 : vector<8x768xf32>
    %148 = vector.broadcast %0 : vector<1x768xf32> to vector<8x768xf32>
    %149 = arith.mulf %147, %148 : vector<8x768xf32>
    %cst_126 = arith.constant dense<0.000000e+00> : vector<8xf32>
    %150 = vector.multi_reduction <add>, %149, %cst_126 [1] : vector<8x768xf32> to vector<8xf32>
    %151 = vector.shape_cast %150 : vector<8xf32> to vector<8x1xf32>
    %cst_127 = arith.constant 0.001953125 : f32
    %152 = vector.broadcast %cst_127 : f32 to vector<8x1xf32>
    %153 = arith.mulf %151, %152 : vector<8x1xf32>
    %cst_128 = arith.constant 9.99999974E-6 : f32
    %154 = vector.broadcast %cst_128 : f32 to vector<8x1xf32>
    %155 = arith.addf %153, %154 : vector<8x1xf32>
    %156 = math.rsqrt %155 : vector<8x1xf32>
    %157 = vector.broadcast %156 : vector<8x1xf32> to vector<8x768xf32>
    %158 = arith.mulf %146, %157 : vector<8x768xf32>
    %cst_129 = arith.constant 0.000000e+00 : f32
    %159 = vector.broadcast %cst_129 : f32 to vector<8x768xf32>
    %160 = arith.cmpf oge, %158, %159 : vector<8x768xf32>
    %cst_130 = arith.constant 1.000000e-01 : f32
    %161 = vector.broadcast %cst_130 : f32 to vector<8x768xf32>
    %162 = arith.mulf %161, %158 : vector<8x768xf32>
    %163 = arith.select %160, %158, %162 : vector<8x768xi1>, vector<8x768xf32>
    %c1_131 = arith.constant 1 : index
    %c0_132 = arith.constant 0 : index
    %c0_133 = arith.constant 0 : index
    %164 = vector.load %arg4[%c1_131, %c0_132, %c0_133] : memref<2x8x768xf32, #tpu.memory_space<vmem>>, vector<1x8x768xf32>
    %165 = vector.shape_cast %164 : vector<1x8x768xf32> to vector<8x768xf32>
    %166 = vector.shape_cast %163 : vector<8x768xf32> to vector<1x8x768xf32>
    tpu.vector_store %arg4[%c1_131, %c0_132, %c0_133], %166 {strides = array<i32>} : memref<2x8x768xf32, #tpu.memory_space<vmem>>, vector<1x8x768xf32>,
    return
  }
  func.func @transform_0(%arg0: i32) -> (i32, i32, i32) {
    %c0_i32 = arith.constant 0 : i32
    %c0_i32_0 = arith.constant 0 : i32
    %c0_i32_1 = arith.constant 0 : i32
    return %arg0, %c0_i32, %c0_i32_0 : i32, i32, i32
  }
  func.func @transform_1(%arg0: i32) -> (i32, i32, i32) {
    %c0_i32 = arith.constant 0 : i32
    %c0_i32_0 = arith.constant 0 : i32
    %c0_i32_1 = arith.constant 0 : i32
    %c0_i32_2 = arith.constant 0 : i32
    return %c0_i32, %c0_i32_0, %c0_i32_1 : i32, i32, i32
  }
  func.func @transform_2(%arg0: i32) -> (i32, i32) {
    %c0_i32 = arith.constant 0 : i32
    %c0_i32_0 = arith.constant 0 : i32
    %c0_i32_1 = arith.constant 0 : i32
    return %c0_i32, %c0_i32_0 : i32, i32
  }
  func.func @transform_3(%arg0: i32) -> (i32, i32, i32) {
    %c0_i32 = arith.constant 0 : i32
    %c0_i32_0 = arith.constant 0 : i32
    %c0_i32_1 = arith.constant 0 : i32
    return %arg0, %c0_i32, %c0_i32_0 : i32, i32, i32
  }
}

</mosaic_0001>

<bundles_post_ra>
// kernel: nn3d_by_2d.1
= control target key start
LH: loop header
LB: loop body
LE: loop exit
PB: predicated region body
PF: predicated region fallthrough
CT: control target
= control target key end

     0   :  { %s5524_s12 = smov 0   ;;  %s6192_s0 = inlined_call_operand.vmem [shape: f32[4,4,896], index: 0, kind: input, shape index: {}]   ;;  %s6193_s1 = inlined_call_operand.vmem [shape: f32[9,8,4], index: 1, kind: input, shape index: {}]   ;;  %s6194_s2 = inlined_call_operand.vmem [shape: f32[1,768], index: 2, kind: input, shape index: {}]   ;;  %s6195_s3 = inlined_call_operand.vmem [shape: f32[4,8,768], index: 3, kind: output, shape index: {}]  }
   0x1 LB: > { %s5135_s13 = sadd.s32 4294967295, %s5493_s12   ;;  %p5139_p0 = scmp.ge.s32.totalorder %s5493_s12, 1  ;;  %s5493_s12 = sphi %s5524_s12, %s13_s12  }
   0x2   : > { %p139_p1 = scmp.lt.s32.totalorder %s5493_s12, 3 }
   0x4   : > { %p140_p2 = pnand %p5139_p0, %p139_p1 }
   0x5   : > { %s5140_s14 = sshll.u32 (!%p140_p2), %s5135_s13, 1  ;;  %s5495_s19 = smov (!%p140_p2), 127   ;;  %v5496_v4 = vmov (!%p140_p2), 0.0   ;;  %vm208_vm0 = vcmask (!%p140_p2), 1039360   ;;  %vm219_vm1 = vcmask (!%p140_p2), 1043456   ;;  %v5144_v31 = vld [vmem:[%s6193_s1 + $0x8] sm:$0xff] (!%p140_p2) }
   0x6   : > { %143 = sbr.rel (%p140_p2) target bundleno = 905 (0x389), region = 32  ;;  %p166_p3 = scmp.lt.s32.totalorder (!%p140_p2), %s5140_s14, 3  ;;  %296 = vmatprep.mubr.f32.mxu0 (!%p140_p2), %v5496_v4  ;;  %2765 = vmatprep.mubr.f32.mxu1 (!%p140_p2), %v5496_v4  ;;  %vm215_vm2 = vcmask (!%p140_p2), 31744   ;;  %v183_v50 = vld [vmem:[%s6193_s1] sm:$0xff] (!%p140_p2)  ;;  %vm700_vm3 = vcmask (!%p140_p2), 1031168   ;;  %vm968_vm4 = vcmask (!%p140_p2), 900096  }
   0x7   : > { %s5497_s20 = smov (!%p140_p2), 126   ;;  %s5498_s21 = smov (!%p140_p2), 110   ;;  %vm1236_vm5 = vcmask (!%p140_p2), 891904   ;;  %vm1504_vm6 = vcmask (!%p140_p2), 883712   ;;  %vm1772_vm7 = vcmask (!%p140_p2), 752640   ;;  %vm2040_vm8 = vcmask (!%p140_p2), 744448  }
   0x8   : > { %s5499_s22 = smov (!%p140_p2), 109   ;;  %s5500_s23 = smov (!%p140_p2), 108   ;;  %vm2308_vm9 = vcmask (!%p140_p2), 736256  }
   0x9   : > { %s5501_s28 = smov (!%p140_p2), 92   ;;  %s5502_s4 = smov (!%p140_p2), 91  }
   0xa   : > { %s5503_s7 = smov (!%p140_p2), 90  }
   0xd   : > { %s6197_s14 = smov (!%p166_p3, %s5140_s14), 3 }
   0xe   : > { %s5458_s15 = smul.u32 28, %s6197_s14 }
  0x10   : > { %s5538_s18 = scalar_lea.vmem %s6192_s0, %s5458_s15 }
  0x11   : > { %v5541_v0 = vld [vmem:[%s5538_s18 + $0x8] sm:$0xff]  ;;  %v5544_v1 = vld [vmem:[%s5538_s18] sm:$0xff]  ;;  %v5573_v8 = vld [vmem:[%s5538_s18 + $0x10] sm:$0xff] }
  0x12   : > { %198 = vrot.lane.b32.xlu0 %v5541_v0, %s5495_s19  ;;  %194 = vrot.lane.b32.xlu1 %v5544_v1, %s5495_s19  ;;  %v5549_v2 = vld [vmem:[%s5538_s18 + $0x24] sm:$0xff]  ;;  %v5552_v3 = vld [vmem:[%s5538_s18 + $0x1c] sm:$0xff]  ;;  %v5564_v6 = vcombine.high %v5544_v1, %v5544_v1  ;;  %v5570_v7 = vcombine.high %v5541_v0, %v5541_v0  ;;  %v5588_v11 = vcombine.high %v5573_v8, %v5573_v8 }
  0x13   : > { %v5560_v5 = vcombine.high %v5552_v3, %v5552_v3  ;;  %v5579_v9 = vcombine.high %v5549_v2, %v5549_v2  ;;  %v5582_v10 = vld [vmem:[%s5538_s18 + $0x2c] sm:$0xff]  ;;  %v184_v12 = vld [vmem:[%s5538_s18 + $0x18] sm:$0xf]  ;;  %v5236_v14 = vld [vmem:[%s5538_s18 + $0x34] sm:$0xf] }
  0x14   : > { %v5594_v13 = vcombine.high %v5582_v10, %v5582_v10  ;;  %v676_v15 = vld [vmem:[%s5538_s18 + $0x18] sm:$0xf]  ;;  %v5259_v16 = vld [vmem:[%s5538_s18 + $0x34] sm:$0xf] }
  0x15   : > { %v944_v17 = vld [vmem:[%s5538_s18 + $0x18] sm:$0xf]  ;;  %v5273_v18 = vld [vmem:[%s5538_s18 + $0x34] sm:$0xf] }
  0x16   : > { %2670 = vrot.lane.b32.xlu0 %v5549_v2, %s5495_s19  ;;  %2666 = vrot.lane.b32.xlu1 %v5552_v3, %s5495_s19  ;;  %v1212_v19 = vld [vmem:[%s5538_s18 + $0x18] sm:$0xf]  ;;  %v5287_v20 = vld [vmem:[%s5538_s18 + $0x34] sm:$0xf] }
  0x17   : > { %v1480_v36 = vld [vmem:[%s5538_s18 + $0x18] sm:$0xf]  ;;  %v5301_v41 = vld [vmem:[%s5538_s18 + $0x34] sm:$0xf] }
  0x1a   : > { %2668 = vrot.lane.b32.xlu1 %v5560_v5, %s5495_s19  ;;  %196 = vrot.lane.b32.xlu0 %v5564_v6, %s5495_s19 }
  0x1e   : > { %202 = vrot.lane.b32.xlu1 %v5573_v8, %s5495_s19  ;;  %200 = vrot.lane.b32.xlu0 %v5570_v7, %s5495_s19 }
  0x22   : > { %2674 = vrot.lane.b32.xlu1 %v5582_v10, %s5495_s19  ;;  %2672 = vrot.lane.b32.xlu0 %v5579_v9, %s5495_s19 }
  0x26   : > { %206 = vrot.lane.b32.xlu1 %v184_v12, %s5495_s19  ;;  %204 = vrot.lane.b32.xlu0 %v5588_v11, %s5495_s19  ;;  %v5163_v12 = vld [vmem:[%s6193_s1 + $0x10] sm:$0xff] }
  0x2a   : > { %2678 = vrot.lane.b32.xlu1 %v5236_v14, %s5495_s19  ;;  %2676 = vrot.lane.b32.xlu0 %v5594_v13, %s5495_s19 }
  0x2e   : > { %690 = vrot.lane.b32.xlu1 %v5541_v0, %s5497_s20  ;;  %688 = vrot.lane.b32.xlu0 %v5564_v6, %s5497_s20 }
  0x32   : > { %3156 = vrot.lane.b32.xlu1 %v5560_v5, %s5497_s20  ;;  %686 = vrot.lane.b32.xlu0 %v5544_v1, %s5497_s20 }
  0x36   : > { %3154 = vrot.lane.b32.xlu1 %v5552_v3, %s5497_s20  ;;  %3158 = vrot.lane.b32.xlu0 %v5549_v2, %s5497_s20 }
  0x3a   : > { %694 = vrot.lane.b32.xlu1 %v5573_v8, %s5497_s20  ;;  %692 = vrot.lane.b32.xlu0 %v5570_v7, %s5497_s20 }
  0x3e   : > { %3162 = vrot.lane.b32.xlu1 %v5582_v10, %s5497_s20  ;;  %3160 = vrot.lane.b32.xlu0 %v5579_v9, %s5497_s20 }
  0x42   : > { %698 = vrot.lane.b32.xlu1 %v676_v15, %s5497_s20  ;;  %696 = vrot.lane.b32.xlu0 %v5588_v11, %s5497_s20 }
  0x46   : > { %3166 = vrot.lane.b32.xlu1 %v5259_v16, %s5497_s20  ;;  %3164 = vrot.lane.b32.xlu0 %v5594_v13, %s5497_s20 }
  0x4a   : > { %958 = vrot.lane.b32.xlu1 %v5541_v0, %s5498_s21  ;;  %956 = vrot.lane.b32.xlu0 %v5564_v6, %s5498_s21 }
  0x4e   : > { %3422 = vrot.lane.b32.xlu1 %v5560_v5, %s5498_s21  ;;  %954 = vrot.lane.b32.xlu0 %v5544_v1, %s5498_s21 }
  0x52   : > { %3420 = vrot.lane.b32.xlu1 %v5552_v3, %s5498_s21  ;;  %3424 = vrot.lane.b32.xlu0 %v5549_v2, %s5498_s21 }
  0x56   : > { %962 = vrot.lane.b32.xlu1 %v5573_v8, %s5498_s21  ;;  %960 = vrot.lane.b32.xlu0 %v5570_v7, %s5498_s21 }
  0x5a   : > { %3428 = vrot.lane.b32.xlu1 %v5582_v10, %s5498_s21  ;;  %3426 = vrot.lane.b32.xlu0 %v5579_v9, %s5498_s21 }
  0x5e   : > { %966 = vrot.lane.b32.xlu1 %v944_v17, %s5498_s21  ;;  %964 = vrot.lane.b32.xlu0 %v5588_v11, %s5498_s21 }
  0x62   : > { %3432 = vrot.lane.b32.xlu1 %v5273_v18, %s5498_s21  ;;  %3430 = vrot.lane.b32.xlu0 %v5594_v13, %s5498_s21  ;;  %v1748_v18 = vld [vmem:[%s5538_s18 + $0x18] sm:$0xf] }
  0x66   : > { %1226 = vrot.lane.b32.xlu1 %v5541_v0, %s5499_s22  ;;  %1224 = vrot.lane.b32.xlu0 %v5564_v6, %s5499_s22 }
  0x6a   : > { %3688 = vrot.lane.b32.xlu1 %v5560_v5, %s5499_s22  ;;  %1222 = vrot.lane.b32.xlu0 %v5544_v1, %s5499_s22 }
  0x6e   : > { %3686 = vrot.lane.b32.xlu1 %v5552_v3, %s5499_s22  ;;  %3690 = vrot.lane.b32.xlu0 %v5549_v2, %s5499_s22 }
  0x72   : > { %1230 = vrot.lane.b32.xlu1 %v5573_v8, %s5499_s22  ;;  %1228 = vrot.lane.b32.xlu0 %v5570_v7, %s5499_s22 }
  0x76   : > { %3694 = vrot.lane.b32.xlu1 %v5582_v10, %s5499_s22  ;;  %3692 = vrot.lane.b32.xlu0 %v5579_v9, %s5499_s22 }
  0x7a   : > { %1234 = vrot.lane.b32.xlu1 %v1212_v19, %s5499_s22  ;;  %1232 = vrot.lane.b32.xlu0 %v5588_v11, %s5499_s22 }
  0x7e   : > { %3698 = vrot.lane.b32.xlu1 %v5287_v20, %s5499_s22  ;;  %3696 = vrot.lane.b32.xlu0 %v5594_v13, %s5499_s22  ;;  %s5459_s22 = smul.u32 48, %s6197_s14 }
  0x80   : > { %s6168_s25 = scalar_lea.vmem %s6195_s3, %s5459_s22 }
  0x82   : > { %1494 = vrot.lane.b32.xlu1 %v5541_v0, %s5500_s23  ;;  %1492 = vrot.lane.b32.xlu0 %v5564_v6, %s5500_s23 }
  0x84   : > { %v199_v21 = vpop.permute.xlu0 %198  ;;  %v195_v22 = vpop.permute.xlu1 %194 }
  0x86   : > { %3954 = vrot.lane.b32.xlu1 %v5560_v5, %s5500_s23  ;;  %1490 = vrot.lane.b32.xlu0 %v5544_v1, %s5500_s23 }
  0x88   : > { %v2671_v23 = vpop.permute.xlu0 %2670  ;;  %v2667_v24 = vpop.permute.xlu1 %2666 }
  0x8a   : > { %3952 = vrot.lane.b32.xlu1 %v5552_v3, %s5500_s23  ;;  %3956 = vrot.lane.b32.xlu0 %v5549_v2, %s5500_s23 }
  0x8c   : > { %v2669_v25 = vpop.permute.xlu1 %2668  ;;  %v197_v26 = vpop.permute.xlu0 %196 }
  0x8d   : > { %v2681_v27 = vsel %vm208_vm0, %v2669_v25, %v2671_v23  ;;  %v210_v28 = vsel %vm208_vm0, %v197_v26, %v199_v21  ;;  %v209_v29 = vsel %vm208_vm0, %v195_v22, %v197_v26  ;;  %v2680_v30 = vsel %vm208_vm0, %v2667_v24, %v2669_v25  ;;  %v5315_v24 = vld [vmem:[%s5538_s18 + $0x34] sm:$0xf] }
  0x8e   : > { %1498 = vrot.lane.b32.xlu1 %v5573_v8, %s5500_s23  ;;  %5238 = vmatprep.subr.msk.mxu1 %vm219_vm1, %v2681_v27 }
  0x8f   : > { %1496 = vrot.lane.b32.xlu0 %v5570_v7, %s5500_s23  ;;  %5145 = vmatprep.subr.msk.mxu0 %vm219_vm1, %v210_v28 }
  0x90   : > { %5146 = vmatpush1.msk.msra.mxu0 %vm219_vm1, %v209_v29  ;;  %5239 = vmatpush1.msk.msra.mxu1 %vm219_vm1, %v2680_v30  ;;  %v203_v32 = vpop.permute.xlu1 %202  ;;  %v201_v33 = vpop.permute.xlu0 %200 }
  0x91   : > { %v211_v34 = vsel %vm208_vm0, %v199_v21, %v201_v33  ;;  %v212_v35 = vsel %vm208_vm0, %v201_v33, %v203_v32  ;;  %5147 = vmatmul.mubr.msk.f32.vlgmr.msra.gmra.mrb[0].mxu0 %vm215_vm2, %v5144_v31  ;;  %5240 = vmatmul.mubr.msk.f32.vlgmr.msra.gmra.mrb[0].mxu1 %vm215_vm2, %v5144_v31 }
  0x92   : > { %3960 = vrot.lane.b32.xlu1 %v5582_v10, %s5500_s23  ;;  %5148 = vmatprep.subr.msk.mxu0 %vm219_vm1, %v212_v35 }
  0x93   : > { %3958 = vrot.lane.b32.xlu0 %v5579_v9, %s5500_s23  ;;  %5149 = vmatpush1.msk.msra.mxu0 %vm219_vm1, %v211_v34  ;;  %v5173_v34 = vld [vmem:[%s6193_s1 + $0x18] sm:$0xff] }
  0x94   : > { %v2675_v37 = vpop.permute.xlu1 %2674  ;;  %v2673_v38 = vpop.permute.xlu0 %2672  ;;  %367 = vmatprep.mubr.f32.mxu0 %v5496_v4  ;;  %2836 = vmatprep.mubr.f32.mxu1 %v5496_v4 }
  0x95   : > { %v2682_v39 = vsel %vm208_vm0, %v2671_v23, %v2673_v38  ;;  %v2683_v40 = vsel %vm208_vm0, %v2673_v38, %v2675_v37  ;;  %5150 = vmatmul.mubr.msk.f32.vlgmr.msra.gmra.mrb[2].mxu0 %vm215_vm2, %v5144_v31 }
  0x96   : > { %1502 = vrot.lane.b32.xlu1 %v1480_v36, %s5500_s23  ;;  %5241 = vmatprep.subr.msk.mxu1 %vm219_vm1, %v2683_v40 }
  0x97   : > { %1500 = vrot.lane.b32.xlu0 %v5588_v11, %s5500_s23  ;;  %5242 = vmatpush1.msk.msra.mxu1 %vm219_vm1, %v2682_v39 }
  0x98   : > { %v207_v42 = vpop.permute.xlu1 %206  ;;  %v205_v43 = vpop.permute.xlu0 %204  ;;  %438 = vmatprep.mubr.f32.mxu0 %v5496_v4  ;;  %5243 = vmatmul.mubr.msk.f32.vlgmr.msra.gmra.mrb[2].mxu1 %vm215_vm2, %v5144_v31 }
  0x99   : > { %v213_v44 = vsel %vm208_vm0, %v203_v32, %v205_v43  ;;  %v214_v45 = vsel %vm208_vm0, %v205_v43, %v207_v42  ;;  %2907 = vmatprep.mubr.f32.mxu1 %v5496_v4 }
  0x9a   : > { %3964 = vrot.lane.b32.xlu1 %v5301_v41, %s5500_s23  ;;  %5151 = vmatprep.subr.msk.mxu0 %vm219_vm1, %v214_v45 }
  0x9b   : > { %3962 = vrot.lane.b32.xlu0 %v5594_v13, %s5500_s23  ;;  %5152 = vmatpush1.msk.msra.mxu0 %vm219_vm1, %v213_v44 }
  0x9c   : > { %v2679_v46 = vpop.permute.xlu1 %2678  ;;  %5153 = vmatmul.mubr.msk.f32.vlgmr.msra.gmra.mrb[4].mxu0 %vm215_vm2, %v5144_v31  ;;  %v2677_v47 = vpop.permute.xlu0 %2676  ;;  %5154 = vmatprep.subr.msk.mxu0 %vm219_vm1, %v5564_v6 }
  0x9d   : > { %v2684_v48 = vsel %vm208_vm0, %v2675_v37, %v2677_v47  ;;  %v2685_v49 = vsel %vm208_vm0, %v2677_v47, %v2679_v46  ;;  %5155 = vmatpush1.msk.msra.mxu0 %vm219_vm1, %v5544_v1  ;;  %524 = vmatprep.mubr.f32.mxu0 %v5496_v4 }
  0x9e   : > { %1762 = vrot.lane.b32.xlu1 %v5541_v0, %s5501_s28  ;;  %5244 = vmatprep.subr.msk.mxu1 %vm219_vm1, %v2685_v49 }
  0x9f   : > { %1760 = vrot.lane.b32.xlu0 %v5564_v6, %s5501_s28  ;;  %5245 = vmatpush1.msk.msra.mxu1 %vm219_vm1, %v2684_v48  ;;  %v2016_v48 = vld [vmem:[%s5538_s18 + $0x18] sm:$0xf] }
  0xa0   : > { %v691_v51 = vpop.permute.xlu1 %690  ;;  %5156 = vmatmul.mubr.msk.f32.vlgmr.msra.gmra.mrb[0].mxu0 %vm215_vm2, %v183_v50  ;;  %5246 = vmatmul.mubr.msk.f32.vlgmr.msra.gmra.mrb[4].mxu1 %vm215_vm2, %v5144_v31  ;;  %v689_v52 = vpop.permute.xlu0 %688 }
  0xa1   : > { %5157 = vmatprep.subr.msk.mxu0 %vm219_vm1, %v5570_v7  ;;  %5247 = vmatprep.subr.msk.mxu1 %vm219_vm1, %v5560_v5  ;;  %v702_v55 = vsel %vm700_vm3, %v689_v52, %v691_v51 }
  0xa2   : > { %4220 = vrot.lane.b32.xlu1 %v5560_v5, %s5501_s28  ;;  %5158 = vmatpush1.msk.msra.mxu0 %vm219_vm1, %v5541_v0 }
  0xa3   : > { %1758 = vrot.lane.b32.xlu0 %v5544_v1, %s5501_s28  ;;  %595 = vmatprep.mubr.f32.mxu0 %v5496_v4 }
  0xa4   : > { %5160 = vmatprep.subr.msk.mxu0 %vm219_vm1, %v5588_v11  ;;  %5248 = vmatpush1.msk.msra.mxu1 %vm219_vm1, %v5552_v3  ;;  %v3157_v53 = vpop.permute.xlu1 %3156  ;;  %v687_v54 = vpop.permute.xlu0 %686 }
  0xa5   : > { %2993 = vmatprep.mubr.f32.mxu1 %v5496_v4  ;;  %5159 = vmatmul.mubr.msk.f32.vlgmr.msra.gmra.mrb[2].mxu0 %vm215_vm2, %v183_v50  ;;  %v701_v58 = vsel %vm700_vm3, %v687_v54, %v689_v52 }
  0xa6   : > { %5161 = vmatpush1.msk.msra.mxu0 %vm219_vm1, %v5573_v8  ;;  %5249 = vmatmul.mubr.msk.f32.vlgmr.msra.gmra.mrb[0].mxu1 %vm215_vm2, %v183_v50 }
  0xa7   : > { %5164 = vmatprep.subr.msk.mxu0 %vm219_vm1, %v702_v55  ;;  %4218 = vrot.lane.b32.xlu1 %v5552_v3, %s5501_s28 }
  0xa8   : > { %4222 = vrot.lane.b32.xlu0 %v5549_v2, %s5501_s28  ;;  %5250 = vmatprep.subr.msk.mxu1 %vm219_vm1, %v5579_v9  ;;  %v3155_v56 = vpop.permute.xlu1 %3154  ;;  %v3159_v57 = vpop.permute.xlu0 %3158 }
  0xa9   : > { %666 = vmatprep.mubr.f32.mxu0 %v5496_v4  ;;  %5251 = vmatpush1.msk.msra.mxu1 %vm219_vm1, %v5549_v2  ;;  %v3169_v59 = vsel %vm700_vm3, %v3157_v53, %v3159_v57  ;;  %v3168_v63 = vsel %vm700_vm3, %v3155_v56, %v3157_v53  ;;  %v5329_v53 = vld [vmem:[%s5538_s18 + $0x34] sm:$0xf] }
  0xaa   : > { %3064 = vmatprep.mubr.f32.mxu1 %v5496_v4  ;;  %5162 = vmatmul.mubr.msk.f32.vlgmr.msra.gmra.mrb[4].mxu0 %vm215_vm2, %v183_v50 }
  0xab   : > { %5165 = vmatpush1.msk.msra.mxu0 %vm219_vm1, %v701_v58  ;;  %5252 = vmatmul.mubr.msk.f32.vlgmr.msra.gmra.mrb[2].mxu1 %vm215_vm2, %v183_v50 }
  0xac   : > { %5253 = vmatprep.subr.msk.mxu1 %vm219_vm1, %v5594_v13  ;;  %1766 = vrot.lane.b32.xlu1 %v5573_v8, %s5501_s28  ;;  %v695_v60 = vpop.permute.xlu1 %694  ;;  %v693_v61 = vpop.permute.xlu0 %692 }
  0xad   : > { %5254 = vmatpush1.msk.msra.mxu1 %vm219_vm1, %v5582_v10  ;;  %1764 = vrot.lane.b32.xlu0 %v5570_v7, %s5501_s28  ;;  %v704_v62 = vsel %vm700_vm3, %v693_v61, %v695_v60  ;;  %v703_v14 = vsel %vm700_vm3, %v691_v51, %v693_v61 }
  0xae   : > { %5261 = vmatprep.subr.msk.mxu1 %vm219_vm1, %v3169_v59  ;;  %3135 = vmatprep.mubr.f32.mxu1 %v5496_v4 }
  0xaf   : > { %5255 = vmatmul.mubr.msk.f32.vlgmr.msra.gmra.mrb[4].mxu1 %vm215_vm2, %v183_v50  ;;  %786 = vmatprep.mubr.f32.mxu0 %v5496_v4 }
  0xb0   : > { %5262 = vmatpush1.msk.msra.mxu1 %vm219_vm1, %v3168_v63  ;;  %4226 = vrot.lane.b32.xlu1 %v5582_v10, %s5501_s28  ;;  %v3163_v15 = vpop.permute.xlu1 %3162  ;;  %v3161_v16 = vpop.permute.xlu0 %3160 }
  0xb1   : > { %4224 = vrot.lane.b32.xlu0 %v5579_v9, %s5501_s28  ;;  %5167 = vmatprep.subr.msk.mxu0 %vm219_vm1, %v704_v62  ;;  %v3171_v17 = vsel %vm700_vm3, %v3161_v16, %v3163_v15  ;;  %v3170_v19 = vsel %vm700_vm3, %v3159_v57, %v3161_v16 }
  0xb2   : > { %5166 = vmatmul.mubr.msk.f32.vlgmr.msra.gmra.mrb[0].mxu0 %vm215_vm2, %v5163_v12  ;;  %3253 = vmatprep.mubr.f32.mxu1 %v5496_v4 }
  0xb3   : > { %5168 = vmatpush1.msk.msra.mxu0 %vm219_vm1, %v703_v14  ;;  %5264 = vmatprep.subr.msk.mxu1 %vm219_vm1, %v3171_v17 }
  0xb4   : > { %1770 = vrot.lane.b32.xlu1 %v1748_v18, %s5501_s28  ;;  %5263 = vmatmul.mubr.msk.f32.vlgmr.msra.gmra.mrb[0].mxu1 %vm215_vm2, %v5163_v12  ;;  %v699_v20 = vpop.permute.xlu1 %698  ;;  %v697_v21 = vpop.permute.xlu0 %696  ;;  %v2284_v18 = vld [vmem:[%s5538_s18 + $0x18] sm:$0xf] }
  0xb5   : > { %1768 = vrot.lane.b32.xlu0 %v5588_v11, %s5501_s28  ;;  %5265 = vmatpush1.msk.msra.mxu1 %vm219_vm1, %v3170_v19  ;;  %v705_v22 = vsel %vm700_vm3, %v695_v60, %v697_v21  ;;  %v706_v23 = vsel %vm700_vm3, %v697_v21, %v699_v20  ;;  %v5343_v21 = vld [vmem:[%s5538_s18 + $0x34] sm:$0xf] }
  0xb6   : > { %857 = vmatprep.mubr.f32.mxu0 %v5496_v4  ;;  %5170 = vmatprep.subr.msk.mxu0 %vm219_vm1, %v706_v23 }
  0xb7   : > { %5169 = vmatmul.mubr.msk.f32.vlgmr.msra.gmra.mrb[2].mxu0 %vm215_vm2, %v5163_v12  ;;  %3324 = vmatprep.mubr.f32.mxu1 %v5496_v4 }
  0xb8   : > { %4230 = vrot.lane.b32.xlu1 %v5315_v24, %s5501_s28  ;;  %5171 = vmatpush1.msk.msra.mxu0 %vm219_vm1, %v705_v22  ;;  %v3167_v25 = vpop.permute.xlu1 %3166  ;;  %v3165_v26 = vpop.permute.xlu0 %3164 }
  0xb9   : > { %4228 = vrot.lane.b32.xlu0 %v5594_v13, %s5501_s28  ;;  %v3172_v27 = vsel %vm700_vm3, %v3163_v15, %v3165_v26  ;;  %v3173_v28 = vsel %vm700_vm3, %v3165_v26, %v3167_v25  ;;  %5266 = vmatmul.mubr.msk.f32.vlgmr.msra.gmra.mrb[2].mxu1 %vm215_vm2, %v5163_v12 }
  0xba   : > { %5267 = vmatprep.subr.msk.mxu1 %vm219_vm1, %v3173_v28  ;;  %928 = vmatprep.mubr.f32.mxu0 %v5496_v4 }
  0xbb   : > { %5268 = vmatpush1.msk.msra.mxu1 %vm219_vm1, %v3172_v27  ;;  %5172 = vmatmul.mubr.msk.f32.vlgmr.msra.gmra.mrb[4].mxu0 %vm215_vm2, %v5163_v12 }
  0xbc   : > { %2030 = vrot.lane.b32.xlu1 %v5541_v0, %s5502_s4  ;;  %v959_v29 = vpop.permute.xlu1 %958  ;;  %v957_v30 = vpop.permute.xlu0 %956  ;;  %3395 = vmatprep.mubr.f32.mxu1 %v5496_v4 }
  0xbd   : > { %2028 = vrot.lane.b32.xlu0 %v5564_v6, %s5502_s4  ;;  %v970_v31 = vsel %vm968_vm4, %v957_v30, %v959_v29  ;;  %5269 = vmatmul.mubr.msk.f32.vlgmr.msra.gmra.mrb[4].mxu1 %vm215_vm2, %v5163_v12 }
  0xbe   : > { %5174 = vmatprep.subr.msk.mxu0 %vm219_vm1, %v970_v31  ;;  %1054 = vmatprep.mubr.f32.mxu0 %v5496_v4 }
  0xbf   : > { %3519 = vmatprep.mubr.f32.mxu1 %v5496_v4 }
  0xc0   : > { %4486 = vrot.lane.b32.xlu1 %v5560_v5, %s5502_s4  ;;  %v3423_v32 = vpop.permute.xlu1 %3422  ;;  %v955_v33 = vpop.permute.xlu0 %954 }
  0xc1   : > { %2026 = vrot.lane.b32.xlu0 %v5544_v1, %s5502_s4  ;;  %v969_v35 = vsel %vm968_vm4, %v955_v33, %v957_v30 }
  0xc2   : > { %5175 = vmatpush1.msk.msra.mxu0 %vm219_vm1, %v969_v35 }
  0xc3   : > { %5176 = vmatmul.mubr.msk.f32.vlgmr.msra.gmra.mrb[0].mxu0 %vm215_vm2, %v5173_v34 }
  0xc4   : > { %4484 = vrot.lane.b32.xlu1 %v5552_v3, %s5502_s4  ;;  %v3421_v36 = vpop.permute.xlu1 %3420  ;;  %v3425_v37 = vpop.permute.xlu0 %3424  ;;  %1125 = vmatprep.mubr.f32.mxu0 %v5496_v4 }
  0xc5   : > { %4488 = vrot.lane.b32.xlu0 %v5549_v2, %s5502_s4  ;;  %v3434_v38 = vsel %vm968_vm4, %v3421_v36, %v3423_v32  ;;  %v3435_v39 = vsel %vm968_vm4, %v3423_v32, %v3425_v37 }
  0xc6   : > { %5275 = vmatprep.subr.msk.mxu1 %vm219_vm1, %v3435_v39 }
  0xc7   : > { %5276 = vmatpush1.msk.msra.mxu1 %vm219_vm1, %v3434_v38 }
  0xc8   : > { %2034 = vrot.lane.b32.xlu1 %v5573_v8, %s5502_s4  ;;  %v963_v40 = vpop.permute.xlu1 %962  ;;  %v961_v41 = vpop.permute.xlu0 %960  ;;  %5277 = vmatmul.mubr.msk.f32.vlgmr.msra.gmra.mrb[0].mxu1 %vm215_vm2, %v5173_v34 }
  0xc9   : > { %2032 = vrot.lane.b32.xlu0 %v5570_v7, %s5502_s4  ;;  %v971_v42 = vsel %vm968_vm4, %v959_v29, %v961_v41  ;;  %v972_v43 = vsel %vm968_vm4, %v961_v41, %v963_v40  ;;  %3590 = vmatprep.mubr.f32.mxu1 %v5496_v4  ;;  %v5193_v29 = vld [vmem:[%s6193_s1 + $0x28] sm:$0xff] }
  0xca   : > { %5177 = vmatprep.subr.msk.mxu0 %vm219_vm1, %v972_v43 }
  0xcb   : > { %5178 = vmatpush1.msk.msra.mxu0 %vm219_vm1, %v971_v42 }
  0xcc   : > { %4492 = vrot.lane.b32.xlu1 %v5582_v10, %s5502_s4  ;;  %v3429_v44 = vpop.permute.xlu1 %3428  ;;  %v3427_v45 = vpop.permute.xlu0 %3426  ;;  %5179 = vmatmul.mubr.msk.f32.vlgmr.msra.gmra.mrb[2].mxu0 %vm215_vm2, %v5173_v34 }
  0xcd   : > { %4490 = vrot.lane.b32.xlu0 %v5579_v9, %s5502_s4  ;;  %v3436_v46 = vsel %vm968_vm4, %v3425_v37, %v3427_v45  ;;  %v3437_v47 = vsel %vm968_vm4, %v3427_v45, %v3429_v44  ;;  %1196 = vmatprep.mubr.f32.mxu0 %v5496_v4 }
  0xce   : > { %5278 = vmatprep.subr.msk.mxu1 %vm219_vm1, %v3437_v47 }
  0xcf   : > { %5279 = vmatpush1.msk.msra.mxu1 %vm219_vm1, %v3436_v46 }
  0xd0   : > { %2038 = vrot.lane.b32.xlu1 %v2016_v48, %s5502_s4  ;;  %v967_v49 = vpop.permute.xlu1 %966  ;;  %v965_v50 = vpop.permute.xlu0 %964  ;;  %5280 = vmatmul.mubr.msk.f32.vlgmr.msra.gmra.mrb[2].mxu1 %vm215_vm2, %v5173_v34 }
  0xd1   : > { %2036 = vrot.lane.b32.xlu0 %v5588_v11, %s5502_s4  ;;  %v973_v51 = vsel %vm968_vm4, %v963_v40, %v965_v50  ;;  %v974_v52 = vsel %vm968_vm4, %v965_v50, %v967_v49  ;;  %3661 = vmatprep.mubr.f32.mxu1 %v5496_v4 }
  0xd2   : > { %5180 = vmatprep.subr.msk.mxu0 %vm219_vm1, %v974_v52 }
  0xd3   : > { %5181 = vmatpush1.msk.msra.mxu0 %vm219_vm1, %v973_v51 }
  0xd4   : > { %4496 = vrot.lane.b32.xlu1 %v5329_v53, %s5502_s4  ;;  %v3433_v54 = vpop.permute.xlu1 %3432  ;;  %v3431_v55 = vpop.permute.xlu0 %3430  ;;  %5182 = vmatmul.mubr.msk.f32.vlgmr.msra.gmra.mrb[4].mxu0 %vm215_vm2, %v5173_v34 }
  0xd5   : > { %4494 = vrot.lane.b32.xlu0 %v5594_v13, %s5502_s4  ;;  %v3438_v56 = vsel %vm968_vm4, %v3429_v44, %v3431_v55  ;;  %v3439_v57 = vsel %vm968_vm4, %v3431_v55, %v3433_v54  ;;  %1322 = vmatprep.mubr.f32.mxu0 %v5496_v4 }
  0xd6   : > { %5281 = vmatprep.subr.msk.mxu1 %vm219_vm1, %v3439_v57 }
  0xd7   : > { %5282 = vmatpush1.msk.msra.mxu1 %vm219_vm1, %v3438_v56  ;;  %v5203_v56 = vld [vmem:[%s6193_s1 + $0x30] sm:$0xff] }
  0xd8   : > { %2298 = vrot.lane.b32.xlu1 %v5541_v0, %s5503_s7  ;;  %v1227_v58 = vpop.permute.xlu1 %1226  ;;  %v1225_v59 = vpop.permute.xlu0 %1224  ;;  %5283 = vmatmul.mubr.msk.f32.vlgmr.msra.gmra.mrb[4].mxu1 %vm215_vm2, %v5173_v34  ;;  %v5183_v0 = vld [vmem:[%s6193_s1 + $0x20] sm:$0xff] }
  0xd9   : > { %2296 = vrot.lane.b32.xlu0 %v5564_v6, %s5503_s7  ;;  %v1238_v60 = vsel %vm1236_vm5, %v1225_v59, %v1227_v58  ;;  %3785 = vmatprep.mubr.f32.mxu1 %v5496_v4 }
  0xda   : > { %5184 = vmatprep.subr.msk.mxu0 %vm219_vm1, %v1238_v60 }
  0xdc   : > { %4752 = vrot.lane.b32.xlu1 %v5560_v5, %s5503_s7  ;;  %v3689_v61 = vpop.permute.xlu1 %3688  ;;  %v1223_v62 = vpop.permute.xlu0 %1222 }
  0xdd   : > { %2294 = vrot.lane.b32.xlu0 %v5544_v1, %s5503_s7  ;;  %v1237_v6 = vsel %vm1236_vm5, %v1223_v62, %v1225_v59 }
  0xde   : > { %5185 = vmatpush1.msk.msra.mxu0 %vm219_vm1, %v1237_v6 }
  0xdf   : > { %5186 = vmatmul.mubr.msk.f32.vlgmr.msra.gmra.mrb[0].mxu0 %vm215_vm2, %v5183_v0 }
  0xe0   : > { %4750 = vrot.lane.b32.xlu1 %v5552_v3, %s5503_s7  ;;  %v3687_v63 = vpop.permute.xlu1 %3686  ;;  %v3691_v5 = vpop.permute.xlu0 %3690  ;;  %1393 = vmatprep.mubr.f32.mxu0 %v5496_v4 }
  0xe1   : > { %4754 = vrot.lane.b32.xlu0 %v5549_v2, %s5503_s7  ;;  %v3700_v12 = vsel %vm1236_vm5, %v3687_v63, %v3689_v61  ;;  %v3701_v1 = vsel %vm1236_vm5, %v3689_v61, %v3691_v5 }
  0xe2   : > { %5289 = vmatprep.subr.msk.mxu1 %vm219_vm1, %v3701_v1 }
  0xe3   : > { %5290 = vmatpush1.msk.msra.mxu1 %vm219_vm1, %v3700_v12 }
  0xe4   : > { %2302 = vrot.lane.b32.xlu1 %v5573_v8, %s5503_s7  ;;  %v1231_v14 = vpop.permute.xlu1 %1230  ;;  %v1229_v3 = vpop.permute.xlu0 %1228  ;;  %5291 = vmatmul.mubr.msk.f32.vlgmr.msra.gmra.mrb[0].mxu1 %vm215_vm2, %v5183_v0 }
  0xe5   : > { %2300 = vrot.lane.b32.xlu0 %v5570_v7, %s5503_s7  ;;  %v1239_v2 = vsel %vm1236_vm5, %v1227_v58, %v1229_v3  ;;  %v1240_v15 = vsel %vm1236_vm5, %v1229_v3, %v1231_v14  ;;  %3856 = vmatprep.mubr.f32.mxu1 %v5496_v4 }
  0xe6   : > { %5187 = vmatprep.subr.msk.mxu0 %vm219_vm1, %v1240_v15 }
  0xe7   : > { %5188 = vmatpush1.msk.msra.mxu0 %vm219_vm1, %v1239_v2 }
  0xe8   : > { %4758 = vrot.lane.b32.xlu1 %v5582_v10, %s5503_s7  ;;  %v3695_v8 = vpop.permute.xlu1 %3694  ;;  %v3693_v16 = vpop.permute.xlu0 %3692  ;;  %5189 = vmatmul.mubr.msk.f32.vlgmr.msra.gmra.mrb[2].mxu0 %vm215_vm2, %v5183_v0 }
  0xe9   : > { %4756 = vrot.lane.b32.xlu0 %v5579_v9, %s5503_s7  ;;  %v3702_v7 = vsel %vm1236_vm5, %v3691_v5, %v3693_v16  ;;  %v3703_v17 = vsel %vm1236_vm5, %v3693_v16, %v3695_v8  ;;  %1464 = vmatprep.mubr.f32.mxu0 %v5496_v4 }
  0xea   : > { %5292 = vmatprep.subr.msk.mxu1 %vm219_vm1, %v3703_v17 }
  0xeb   : > { %5293 = vmatpush1.msk.msra.mxu1 %vm219_vm1, %v3702_v7 }
  0xec   : > { %2306 = vrot.lane.b32.xlu1 %v2284_v18, %s5503_s7  ;;  %v1235_v10 = vpop.permute.xlu1 %1234  ;;  %v1233_v19 = vpop.permute.xlu0 %1232  ;;  %5294 = vmatmul.mubr.msk.f32.vlgmr.msra.gmra.mrb[2].mxu1 %vm215_vm2, %v5183_v0 }
  0xed   : > { %2304 = vrot.lane.b32.xlu0 %v5588_v11, %s5503_s7  ;;  %v1241_v9 = vsel %vm1236_vm5, %v1231_v14, %v1233_v19  ;;  %v1242_v20 = vsel %vm1236_vm5, %v1233_v19, %v1235_v10  ;;  %3927 = vmatprep.mubr.f32.mxu1 %v5496_v4 }
  0xee   : > { %5190 = vmatprep.subr.msk.mxu0 %vm219_vm1, %v1242_v20 }
  0xef   : > { %5191 = vmatpush1.msk.msra.mxu0 %vm219_vm1, %v1241_v9 }
  0xf0   : > { %4762 = vrot.lane.b32.xlu1 %v5343_v21, %s5503_s7  ;;  %v3699_v22 = vpop.permute.xlu1 %3698  ;;  %v3697_v23 = vpop.permute.xlu0 %3696  ;;  %5192 = vmatmul.mubr.msk.f32.vlgmr.msra.gmra.mrb[4].mxu0 %vm215_vm2, %v5183_v0 }
  0xf1   : > { %4760 = vrot.lane.b32.xlu0 %v5594_v13, %s5503_s7  ;;  %v3704_v11 = vsel %vm1236_vm5, %v3695_v8, %v3697_v23  ;;  %v3705_v24 = vsel %vm1236_vm5, %v3697_v23, %v3699_v22  ;;  %1590 = vmatprep.mubr.f32.mxu0 %v5496_v4  ;;  %v5213_v22 = vld [vmem:[%s6193_s1 + $0x38] sm:$0xff] }
  0xf2   : > { %5295 = vmatprep.subr.msk.mxu1 %vm219_vm1, %v3705_v24 }
  0xf3   : > { %5296 = vmatpush1.msk.msra.mxu1 %vm219_vm1, %v3704_v11 }
  0xf4   : > { %v1495_v25 = vpop.permute.xlu1 %1494  ;;  %v1493_v26 = vpop.permute.xlu0 %1492  ;;  %5297 = vmatmul.mubr.msk.f32.vlgmr.msra.gmra.mrb[4].mxu1 %vm215_vm2, %v5183_v0 }
  0xf5   : > { %v1506_v27 = vsel %vm1504_vm6, %v1493_v26, %v1495_v25  ;;  %4051 = vmatprep.mubr.f32.mxu1 %v5496_v4 }
  0xf6   : > { %5194 = vmatprep.subr.msk.mxu0 %vm219_vm1, %v1506_v27 }
  0xf8   : > { %v3955_v13 = vpop.permute.xlu1 %3954  ;;  %v1491_v28 = vpop.permute.xlu0 %1490 }
  0xf9   : > { %v1505_v30 = vsel %vm1504_vm6, %v1491_v28, %v1493_v26 }
  0xfa   : > { %5195 = vmatpush1.msk.msra.mxu0 %vm219_vm1, %v1505_v30 }
  0xfb   : > { %5196 = vmatmul.mubr.msk.f32.vlgmr.msra.gmra.mrb[0].mxu0 %vm215_vm2, %v5193_v29 }
  0xfc   : > { %v3953_v31 = vpop.permute.xlu1 %3952  ;;  %v3957_v32 = vpop.permute.xlu0 %3956  ;;  %1661 = vmatprep.mubr.f32.mxu0 %v5496_v4 }
  0xfd   : > { %v3966_v33 = vsel %vm1504_vm6, %v3953_v31, %v3955_v13  ;;  %v3967_v34 = vsel %vm1504_vm6, %v3955_v13, %v3957_v32 }
  0xfe   : > { %5303 = vmatprep.subr.msk.mxu1 %vm219_vm1, %v3967_v34 }
  0xff   : > { %5304 = vmatpush1.msk.msra.mxu1 %vm219_vm1, %v3966_v33 }
 0x100   : > { %v1499_v35 = vpop.permute.xlu1 %1498  ;;  %5305 = vmatmul.mubr.msk.f32.vlgmr.msra.gmra.mrb[0].mxu1 %vm215_vm2, %v5193_v29 }
 0x101   : > { %v1497_v36 = vpop.permute.xlu0 %1496  ;;  %4122 = vmatprep.mubr.f32.mxu1 %v5496_v4 }
 0x102   : > { %v1507_v37 = vsel %vm1504_vm6, %v1495_v25, %v1497_v36  ;;  %v1508_v38 = vsel %vm1504_vm6, %v1497_v36, %v1499_v35 }
 0x103   : > { %5197 = vmatprep.subr.msk.mxu0 %vm219_vm1, %v1508_v38 }
 0x104   : > { %5198 = vmatpush1.msk.msra.mxu0 %vm219_vm1, %v1507_v37  ;;  %v3961_v39 = vpop.permute.xlu1 %3960 }
 0x105   : > { %v3959_v40 = vpop.permute.xlu0 %3958  ;;  %5199 = vmatmul.mubr.msk.f32.vlgmr.msra.gmra.mrb[2].mxu0 %vm215_vm2, %v5193_v29 }
 0x106   : > { %v3968_v41 = vsel %vm1504_vm6, %v3957_v32, %v3959_v40  ;;  %v3969_v42 = vsel %vm1504_vm6, %v3959_v40, %v3961_v39  ;;  %1732 = vmatprep.mubr.f32.mxu0 %v5496_v4 }
 0x107   : > { %5306 = vmatprep.subr.msk.mxu1 %vm219_vm1, %v3969_v42 }
 0x108   : > { %5307 = vmatpush1.msk.msra.mxu1 %vm219_vm1, %v3968_v41  ;;  %v1503_v43 = vpop.permute.xlu1 %1502 }
 0x109   : > { %v1501_v44 = vpop.permute.xlu0 %1500  ;;  %5308 = vmatmul.mubr.msk.f32.vlgmr.msra.gmra.mrb[2].mxu1 %vm215_vm2, %v5193_v29 }
 0x10a   : > { %v1509_v45 = vsel %vm1504_vm6, %v1499_v35, %v1501_v44  ;;  %v1510_v46 = vsel %vm1504_vm6, %v1501_v44, %v1503_v43  ;;  %4193 = vmatprep.mubr.f32.mxu1 %v5496_v4 }
 0x10b   : > { %5200 = vmatprep.subr.msk.mxu0 %vm219_vm1, %v1510_v46 }
 0x10c   : > { %5201 = vmatpush1.msk.msra.mxu0 %vm219_vm1, %v1509_v45  ;;  %v3965_v47 = vpop.permute.xlu1 %3964 }
 0x10d   : > { %v3963_v48 = vpop.permute.xlu0 %3962  ;;  %5202 = vmatmul.mubr.msk.f32.vlgmr.msra.gmra.mrb[4].mxu0 %vm215_vm2, %v5193_v29 }
 0x10e   : > { %v3970_v49 = vsel %vm1504_vm6, %v3961_v39, %v3963_v48  ;;  %v3971_v50 = vsel %vm1504_vm6, %v3963_v48, %v3965_v47  ;;  %1858 = vmatprep.mubr.f32.mxu0 %v5496_v4  ;;  %v5223_v47 = vld [vmem:[%s6193_s1 + $0x40] sm:$0xff] }
 0x10f   : > { %5309 = vmatprep.subr.msk.mxu1 %vm219_vm1, %v3971_v50 }
 0x110   : > { %5310 = vmatpush1.msk.msra.mxu1 %vm219_vm1, %v3970_v49  ;;  %v1763_v51 = vpop.permute.xlu1 %1762 }
 0x111   : > { %v1761_v52 = vpop.permute.xlu0 %1760  ;;  %5311 = vmatmul.mubr.msk.f32.vlgmr.msra.gmra.mrb[4].mxu1 %vm215_vm2, %v5193_v29 }
 0x112   : > { %v1774_v53 = vsel %vm1772_vm7, %v1761_v52, %v1763_v51  ;;  %4317 = vmatprep.mubr.f32.mxu1 %v5496_v4 }
 0x113   : > { %5204 = vmatprep.subr.msk.mxu0 %vm219_vm1, %v1774_v53 }
 0x114   : > { %v4221_v54 = vpop.permute.xlu1 %4220 }
 0x115   : > { %v1759_v55 = vpop.permute.xlu0 %1758 }
 0x116   : > { %v1773_v57 = vsel %vm1772_vm7, %v1759_v55, %v1761_v52 }
 0x117   : > { %5205 = vmatpush1.msk.msra.mxu0 %vm219_vm1, %v1773_v57 }
 0x118   : > { %5206 = vmatmul.mubr.msk.f32.vlgmr.msra.gmra.mrb[0].mxu0 %vm215_vm2, %v5203_v56 }
 0x119   : > { %v4219_v58 = vpop.permute.xlu1 %4218  ;;  %1929 = vmatprep.mubr.f32.mxu0 %v5496_v4 }
 0x11a   : > { %v4232_v59 = vsel %vm1772_vm7, %v4219_v58, %v4221_v54  ;;  %v4223_v60 = vpop.permute.xlu0 %4222 }
 0x11b   : > { %v4233_v61 = vsel %vm1772_vm7, %v4221_v54, %v4223_v60 }
 0x11c   : > { %5317 = vmatprep.subr.msk.mxu1 %vm219_vm1, %v4233_v61 }
 0x11d   : > { %5318 = vmatpush1.msk.msra.mxu1 %vm219_vm1, %v4232_v59 }
 0x11e   : > { %v1767_v62 = vpop.permute.xlu1 %1766  ;;  %5319 = vmatmul.mubr.msk.f32.vlgmr.msra.gmra.mrb[0].mxu1 %vm215_vm2, %v5203_v56 }
 0x11f   : > { %v1765_v0 = vpop.permute.xlu0 %1764  ;;  %4388 = vmatprep.mubr.f32.mxu1 %v5496_v4 }
 0x120   : > { %v1775_v6 = vsel %vm1772_vm7, %v1763_v51, %v1765_v0  ;;  %v1776_v63 = vsel %vm1772_vm7, %v1765_v0, %v1767_v62 }
 0x121   : > { %5207 = vmatprep.subr.msk.mxu0 %vm219_vm1, %v1776_v63 }
 0x122   : > { %5208 = vmatpush1.msk.msra.mxu0 %vm219_vm1, %v1775_v6  ;;  %v4227_v5 = vpop.permute.xlu1 %4226 }
 0x123   : > { %v4225_v12 = vpop.permute.xlu0 %4224  ;;  %5209 = vmatmul.mubr.msk.f32.vlgmr.msra.gmra.mrb[2].mxu0 %vm215_vm2, %v5203_v56 }
 0x124   : > { %v4234_v1 = vsel %vm1772_vm7, %v4223_v60, %v4225_v12  ;;  %v4235_v14 = vsel %vm1772_vm7, %v4225_v12, %v4227_v5  ;;  %2000 = vmatprep.mubr.f32.mxu0 %v5496_v4 }
 0x125   : > { %5320 = vmatprep.subr.msk.mxu1 %vm219_vm1, %v4235_v14  ;;  %v2550_v14 = vlaneseq }
 0x126   : > { %5321 = vmatpush1.msk.msra.mxu1 %vm219_vm1, %v4234_v1  ;;  %v1771_v3 = vpop.permute.xlu1 %1770 }
 0x127   : > { %v1769_v2 = vpop.permute.xlu0 %1768  ;;  %5322 = vmatmul.mubr.msk.f32.vlgmr.msra.gmra.mrb[2].mxu1 %vm215_vm2, %v5203_v56 }
 0x128   : > { %v1777_v15 = vsel %vm1772_vm7, %v1767_v62, %v1769_v2  ;;  %v1778_v8 = vsel %vm1772_vm7, %v1769_v2, %v1771_v3  ;;  %4459 = vmatprep.mubr.f32.mxu1 %v5496_v4  ;;  %v179_v2 = vld [vmem:[%s6194_s2] sm:$0x3f] }
 0x129   : > { %5210 = vmatprep.subr.msk.mxu0 %vm219_vm1, %v1778_v8 }
 0x12a   : > { %5211 = vmatpush1.msk.msra.mxu0 %vm219_vm1, %v1777_v15  ;;  %v4231_v16 = vpop.permute.xlu1 %4230 }
 0x12b   : > { %v4229_v7 = vpop.permute.xlu0 %4228  ;;  %5212 = vmatmul.mubr.msk.f32.vlgmr.msra.gmra.mrb[4].mxu0 %vm215_vm2, %v5203_v56 }
 0x12c   : > { %v4236_v17 = vsel %vm1772_vm7, %v4227_v5, %v4229_v7  ;;  %v4237_v18 = vsel %vm1772_vm7, %v4229_v7, %v4231_v16  ;;  %2126 = vmatprep.mubr.f32.mxu0 %v5496_v4 }
 0x12d   : > { %5323 = vmatprep.subr.msk.mxu1 %vm219_vm1, %v4237_v18 }
 0x12e   : > { %5324 = vmatpush1.msk.msra.mxu1 %vm219_vm1, %v4236_v17  ;;  %v2031_v10 = vpop.permute.xlu1 %2030 }
 0x12f   : > { %v2029_v19 = vpop.permute.xlu0 %2028  ;;  %5325 = vmatmul.mubr.msk.f32.vlgmr.msra.gmra.mrb[4].mxu1 %vm215_vm2, %v5203_v56 }
 0x130   : > { %v2042_v9 = vsel %vm2040_vm8, %v2029_v19, %v2031_v10  ;;  %4583 = vmatprep.mubr.f32.mxu1 %v5496_v4 }
 0x131   : > { %5214 = vmatprep.subr.msk.mxu0 %vm219_vm1, %v2042_v9 }
 0x132   : > { %v4487_v20 = vpop.permute.xlu1 %4486 }
 0x133   : > { %v2027_v21 = vpop.permute.xlu0 %2026 }
 0x134   : > { %v2041_v23 = vsel %vm2040_vm8, %v2027_v21, %v2029_v19 }
 0x135   : > { %5215 = vmatpush1.msk.msra.mxu0 %vm219_vm1, %v2041_v23 }
 0x136   : > { %v4485_v11 = vpop.permute.xlu1 %4484  ;;  %5216 = vmatmul.mubr.msk.f32.vlgmr.msra.gmra.mrb[0].mxu0 %vm215_vm2, %v5213_v22 }
 0x137   : > { %v4498_v24 = vsel %vm2040_vm8, %v4485_v11, %v4487_v20  ;;  %v4489_v25 = vpop.permute.xlu0 %4488  ;;  %2197 = vmatprep.mubr.f32.mxu0 %v5496_v4 }
 0x138   : > { %v4499_v26 = vsel %vm2040_vm8, %v4487_v20, %v4489_v25 }
 0x139   : > { %5331 = vmatprep.subr.msk.mxu1 %vm219_vm1, %v4499_v26 }
 0x13a   : > { %5332 = vmatpush1.msk.msra.mxu1 %vm219_vm1, %v4498_v24  ;;  %v2035_v27 = vpop.permute.xlu1 %2034 }
 0x13b   : > { %v2033_v13 = vpop.permute.xlu0 %2032  ;;  %5333 = vmatmul.mubr.msk.f32.vlgmr.msra.gmra.mrb[0].mxu1 %vm215_vm2, %v5213_v22 }
 0x13c   : > { %v2043_v28 = vsel %vm2040_vm8, %v2031_v10, %v2033_v13  ;;  %v2044_v29 = vsel %vm2040_vm8, %v2033_v13, %v2035_v27  ;;  %4654 = vmatprep.mubr.f32.mxu1 %v5496_v4 }
 0x13d   : > { %5217 = vmatprep.subr.msk.mxu0 %vm219_vm1, %v2044_v29 }
 0x13e   : > { %5218 = vmatpush1.msk.msra.mxu0 %vm219_vm1, %v2043_v28  ;;  %v4493_v30 = vpop.permute.xlu1 %4492 }
 0x13f   : > { %v4491_v31 = vpop.permute.xlu0 %4490  ;;  %5219 = vmatmul.mubr.msk.f32.vlgmr.msra.gmra.mrb[2].mxu0 %vm215_vm2, %v5213_v22 }
 0x140   : > { %v4500_v32 = vsel %vm2040_vm8, %v4489_v25, %v4491_v31  ;;  %v4501_v33 = vsel %vm2040_vm8, %v4491_v31, %v4493_v30  ;;  %2268 = vmatprep.mubr.f32.mxu0 %v5496_v4 }
 0x141   : > { %5334 = vmatprep.subr.msk.mxu1 %vm219_vm1, %v4501_v33 }
 0x142   : > { %5335 = vmatpush1.msk.msra.mxu1 %vm219_vm1, %v4500_v32  ;;  %v2039_v34 = vpop.permute.xlu1 %2038 }
 0x143   : > { %v2037_v35 = vpop.permute.xlu0 %2036  ;;  %5336 = vmatmul.mubr.msk.f32.vlgmr.msra.gmra.mrb[2].mxu1 %vm215_vm2, %v5213_v22 }
 0x144   : > { %v2045_v36 = vsel %vm2040_vm8, %v2035_v27, %v2037_v35  ;;  %v2046_v37 = vsel %vm2040_vm8, %v2037_v35, %v2039_v34  ;;  %4725 = vmatprep.mubr.f32.mxu1 %v5496_v4 }
 0x145   : > { %5220 = vmatprep.subr.msk.mxu0 %vm219_vm1, %v2046_v37 }
 0x146   : > { %5221 = vmatpush1.msk.msra.mxu0 %vm219_vm1, %v2045_v36  ;;  %v4497_v38 = vpop.permute.xlu1 %4496 }
 0x147   : > { %v4495_v39 = vpop.permute.xlu0 %4494  ;;  %5222 = vmatmul.mubr.msk.f32.vlgmr.msra.gmra.mrb[4].mxu0 %vm215_vm2, %v5213_v22 }
 0x148   : > { %v4502_v40 = vsel %vm2040_vm8, %v4493_v30, %v4495_v39  ;;  %v4503_v41 = vsel %vm2040_vm8, %v4495_v39, %v4497_v38  ;;  %2394 = vmatprep.mubr.f32.mxu0 %v5496_v4 }
 0x149   : > { %5337 = vmatprep.subr.msk.mxu1 %vm219_vm1, %v4503_v41 }
 0x14a   : > { %5338 = vmatpush1.msk.msra.mxu1 %vm219_vm1, %v4502_v40  ;;  %v2299_v42 = vpop.permute.xlu1 %2298 }
 0x14b   : > { %v2297_v43 = vpop.permute.xlu0 %2296  ;;  %5339 = vmatmul.mubr.msk.f32.vlgmr.msra.gmra.mrb[4].mxu1 %vm215_vm2, %v5213_v22 }
 0x14c   : > { %v2310_v44 = vsel %vm2308_vm9, %v2297_v43, %v2299_v42  ;;  %4849 = vmatprep.mubr.f32.mxu1 %v5496_v4 }
 0x14d   : > { %5224 = vmatprep.subr.msk.mxu0 %vm219_vm1, %v2310_v44 }
 0x14e   : > { %v4753_v45 = vpop.permute.xlu1 %4752 }
 0x14f   : > { %v2295_v46 = vpop.permute.xlu0 %2294 }
 0x150   : > { %v2309_v48 = vsel %vm2308_vm9, %v2295_v46, %v2297_v43 }
 0x151   : > { %5225 = vmatpush1.msk.msra.mxu0 %vm219_vm1, %v2309_v48 }
 0x152   : > { %5226 = vmatmul.mubr.msk.f32.vlgmr.msra.gmra.mrb[0].mxu0 %vm215_vm2, %v5223_v47  ;;  %v4751_v49 = vpop.permute.xlu1 %4750 }
 0x153   : > { %v4764_v50 = vsel %vm2308_vm9, %v4751_v49, %v4753_v45  ;;  %v4755_v51 = vpop.permute.xlu0 %4754  ;;  %2465 = vmatprep.mubr.f32.mxu0 %v5496_v4 }
 0x154   : > { %v4765_v52 = vsel %vm2308_vm9, %v4753_v45, %v4755_v51 }
 0x155   : > { %5345 = vmatprep.subr.msk.mxu1 %vm219_vm1, %v4765_v52 }
 0x156   : > { %5346 = vmatpush1.msk.msra.mxu1 %vm219_vm1, %v4764_v50  ;;  %v2303_v53 = vpop.permute.xlu1 %2302 }
 0x157   : > { %5347 = vmatmul.mubr.msk.f32.vlgmr.msra.gmra.mrb[0].mxu1 %vm215_vm2, %v5223_v47  ;;  %v2301_v54 = vpop.permute.xlu0 %2300 }
 0x158   : > { %v2311_v55 = vsel %vm2308_vm9, %v2299_v42, %v2301_v54  ;;  %v2312_v56 = vsel %vm2308_vm9, %v2301_v54, %v2303_v53  ;;  %4920 = vmatprep.mubr.f32.mxu1 %v5496_v4 }
 0x159   : > { %5227 = vmatprep.subr.msk.mxu0 %vm219_vm1, %v2312_v56 }
 0x15a   : > { %5228 = vmatpush1.msk.msra.mxu0 %vm219_vm1, %v2311_v55  ;;  %v4759_v57 = vpop.permute.xlu1 %4758 }
 0x15b   : > { %5229 = vmatmul.mubr.msk.f32.vlgmr.msra.gmra.mrb[2].mxu0 %vm215_vm2, %v5223_v47  ;;  %v4757_v58 = vpop.permute.xlu0 %4756 }
 0x15c   : > { %v4766_v59 = vsel %vm2308_vm9, %v4755_v51, %v4757_v58  ;;  %v4767_v60 = vsel %vm2308_vm9, %v4757_v58, %v4759_v57  ;;  %2536 = vmatprep.mubr.f32.mxu0 %v5496_v4 }
 0x15d   : > { %5348 = vmatprep.subr.msk.mxu1 %vm219_vm1, %v4767_v60 }
 0x15e   : > { %5349 = vmatpush1.msk.msra.mxu1 %vm219_vm1, %v4766_v59  ;;  %v2307_v61 = vpop.permute.xlu1 %2306 }
 0x15f   : > { %5350 = vmatmul.mubr.msk.f32.vlgmr.msra.gmra.mrb[2].mxu1 %vm215_vm2, %v5223_v47  ;;  %v2305_v62 = vpop.permute.xlu0 %2304 }
 0x160   : > { %v2313_v0 = vsel %vm2308_vm9, %v2303_v53, %v2305_v62  ;;  %v2314_v6 = vsel %vm2308_vm9, %v2305_v62, %v2307_v61  ;;  %4991 = vmatprep.mubr.f32.mxu1 %v5496_v4  ;;  %v2551_v4 = vshrl.u32 %v2550_v14, 7 }
 0x161   : > { %5230 = vmatprep.subr.msk.mxu0 %vm219_vm1, %v2314_v6 }
 0x162   : > { %5231 = vmatpush1.msk.msra.mxu0 %vm219_vm1, %v2313_v0  ;;  %v4763_v63 = vpop.permute.xlu1 %4762  ;;  %v2552_v3 = vsub.s32 0, %v2551_v4  ;;  %v2556_v15 = vsub.s32 1, %v2551_v4  ;;  %v2560_v19 = vsub.s32 2, %v2551_v4  ;;  %v2564_v9 = vsub.s32 3, %v2551_v4 }
 0x163   : > { %5232 = vmatmul.mubr.msk.f32.vlgmr.msra.gmra.mrb[4].mxu0 %vm215_vm2, %v5223_v47  ;;  %v4761_v5 = vpop.permute.xlu0 %4760  ;;  %v2568_v29 = vsub.s32 4, %v2551_v4  ;;  %v2572_v31 = vsub.s32 5, %v2551_v4 }
 0x164   : > { %v4768_v12 = vsel %vm2308_vm9, %v4759_v57, %v4761_v5  ;;  %v4769_v1 = vsel %vm2308_vm9, %v4761_v5, %v4763_v63  ;;  %v6104_v8 = vrot.slane %v179_v2, %v2552_v3  ;;  %v6106_v16 = vrot.slane %v179_v2, %v2556_v15 }
 0x165   : > { %5351 = vmatprep.subr.msk.mxu1 %vm219_vm1, %v4769_v1  ;;  %v6111_v11 = vrot.slane %v179_v2, %v2560_v19  ;;  %v6114_v25 = vrot.slane %v179_v2, %v2564_v9  ;;  %v6119_v37 = vrot.slane %v179_v2, %v2568_v29  ;;  %v6122_v39 = vrot.slane %v179_v2, %v2572_v31 }
 0x166   : > { %5352 = vmatpush1.msk.msra.mxu1 %vm219_vm1, %v4768_v12 }
 0x167   : > { %5353 = vmatmul.mubr.msk.f32.vlgmr.msra.gmra.mrb[4].mxu1 %vm215_vm2, %v5223_v47 }
 0x225   : > { %v2396_v7 = vpop.f32.mrb[0].mxu0 }
 0x226   : > { %v2580_v17 = vmul.f32 %v6104_v8, %v2396_v7  ;;  %v2398_v18 = vpop.f32.mrb[1].mxu0 }
 0x227   : > { %v2581_v10 = vmul.f32 %v6106_v16, %v2398_v18 }
 0x229   : > { %v2586_v20 = vadd.f32 %v2581_v10, %v2580_v17 }
 0x22a   : > { %v4851_v21 = vpop.f32.mrb[0].mxu1 }
 0x22b   : > { %v5004_v22 = vmul.f32 %v4851_v21, %v6104_v8  ;;  %v4853_v23 = vpop.f32.mrb[1].mxu1 }
 0x22c   : > { %v5005_v24 = vmul.f32 %v4853_v23, %v6106_v16 }
 0x22e   : > { %v5010_v26 = vadd.f32 %v5005_v24, %v5004_v22  ;;  %v2467_v27 = vpop.f32.mrb[2].mxu0 }
 0x22f   : > { %v2582_v13 = vmul.f32 %v6111_v11, %v2467_v27  ;;  %v2469_v28 = vpop.f32.mrb[3].mxu0 }
 0x230   : > { %v2583_v30 = vmul.f32 %v6114_v25, %v2469_v28 }
 0x231   : > { %v2587_v32 = vadd.f32 %v2586_v20, %v2582_v13 }
 0x232   : > { %v4922_v33 = vpop.f32.mrb[2].mxu1 }
 0x233   : > { %v2588_v34 = vadd.f32 %v2587_v32, %v2583_v30  ;;  %v5006_v35 = vmul.f32 %v4922_v33, %v6111_v11  ;;  %v4924_v36 = vpop.f32.mrb[3].mxu1 }
 0x234   : > { %v5007_v38 = vmul.f32 %v4924_v36, %v6114_v25 }
 0x235   : > { %v5011_v40 = vadd.f32 %v5010_v26, %v5006_v35 }
 0x236   : > { %v2538_v41 = vpop.f32.mrb[4].mxu0 }
 0x237   : > { %v5012_v42 = vadd.f32 %v5011_v40, %v5007_v38  ;;  %v2584_v43 = vmul.f32 %v6119_v37, %v2538_v41  ;;  %v2540_v44 = vpop.f32.mrb[5].mxu0 }
 0x238   : > { %v2585_v45 = vmul.f32 %v6122_v39, %v2540_v44 }
 0x239   : > { %v2589_v46 = vadd.f32 %v2588_v34, %v2584_v43 }
 0x23a   : > { %v4993_v47 = vpop.f32.mrb[4].mxu1 }
 0x23b   : > { %v2590_v48 = vadd.f32 %v2589_v46, %v2585_v45  ;;  %v5008_v49 = vmul.f32 %v4993_v47, %v6119_v37  ;;  %v4995_v50 = vpop.f32.mrb[5].mxu1 }
 0x23c   : > { %v5009_v51 = vmul.f32 %v4995_v50, %v6122_v39 }
 0x23d   : > { %v5013_v52 = vadd.f32 %v5012_v42, %v5008_v49  ;;  %2591 = vadd.xlane.f32.xlu0 %v2590_v48 }
 0x23f   : > { %v5014_v53 = vadd.f32 %v5013_v52, %v5009_v51 }
 0x241   : > { %5015 = vadd.xlane.f32.xlu1 %v5014_v53 }
 0x2ca   : > { %v2592_v54 = vpop.xlane.xlu0 %2591 }
 0x2cb   : > { %v2593_v55 = vmul.f32 0.001953125, %v2592_v54 }
 0x2cd   : > { %v2594_v56 = vsub.f32 %v2396_v7, %v2593_v55  ;;  %v2595_v57 = vsub.f32 %v2398_v18, %v2593_v55  ;;  %v2596_v58 = vsub.f32 %v2467_v27, %v2593_v55  ;;  %v2597_v59 = vsub.f32 %v2469_v28, %v2593_v55 }
 0x2ce   : > { %v5016_v60 = vpop.xlane.xlu1 %5015  ;;  %v2598_v61 = vsub.f32 %v2538_v41, %v2593_v55  ;;  %v2599_v5 = vsub.f32 %v2540_v44, %v2593_v55 }
 0x2cf   : > { %v5017_v62 = vmul.f32 0.001953125, %v5016_v60  ;;  %v2600_v0 = vmul.f32 %v2594_v56, %v2594_v56  ;;  %v2601_v6 = vmul.f32 %v2595_v57, %v2595_v57  ;;  %v2602_v63 = vmul.f32 %v2596_v58, %v2596_v58 }
 0x2d0   : > { %v2603_v12 = vmul.f32 %v2597_v59, %v2597_v59  ;;  %v2604_v2 = vmul.f32 %v2598_v61, %v2598_v61  ;;  %v2605_v20 = vmul.f32 %v2599_v5, %v2599_v5 }
 0x2d1   : > { %v6128_v1 = vsub.f32 %v4851_v21, %v5017_v62  ;;  %v6130_v14 = vsub.f32 %v4853_v23, %v5017_v62  ;;  %v2606_v4 = vmul.f32 %v2600_v0, %v6104_v8  ;;  %v2607_v3 = vmul.f32 %v2601_v6, %v6106_v16 }
 0x2d2   : > { %v2608_v15 = vmul.f32 %v2602_v63, %v6111_v11  ;;  %v6135_v17 = vsub.f32 %v4922_v33, %v5017_v62  ;;  %v6137_v18 = vsub.f32 %v4924_v36, %v5017_v62  ;;  %v6139_v10 = vsub.f32 %v4993_v47, %v5017_v62 }
 0x2d3   : > { %v2612_v7 = vadd.f32 %v2607_v3, %v2606_v4  ;;  %v5024_v19 = vmul.f32 %v6128_v1, %v6128_v1  ;;  %v5025_v9 = vmul.f32 %v6130_v14, %v6130_v14  ;;  %v2609_v21 = vmul.f32 %v2603_v12, %v6114_v25 }
 0x2d4   : > { %v5026_v23 = vmul.f32 %v6135_v17, %v6135_v17  ;;  %v6148_v24 = vsub.f32 %v4995_v50, %v5017_v62  ;;  %v5027_v26 = vmul.f32 %v6137_v18, %v6137_v18  ;;  %v2610_v28 = vmul.f32 %v2604_v2, %v6119_v37 }
 0x2d5   : > { %v2613_v22 = vadd.f32 %v2612_v7, %v2608_v15  ;;  %v5030_v27 = vmul.f32 %v5024_v19, %v6104_v8  ;;  %v5031_v13 = vmul.f32 %v5025_v9, %v6106_v16  ;;  %v5028_v30 = vmul.f32 %v6139_v10, %v6139_v10 }
 0x2d6   : > { %v5032_v31 = vmul.f32 %v5026_v23, %v6111_v11  ;;  %v2611_v33 = vmul.f32 %v2605_v20, %v6122_v39  ;;  %v5029_v35 = vmul.f32 %v6148_v24, %v6148_v24  ;;  %v5033_v36 = vmul.f32 %v5027_v26, %v6114_v25 }
 0x2d7   : > { %v2614_v29 = vadd.f32 %v2613_v22, %v2609_v21  ;;  %v5036_v32 = vadd.f32 %v5031_v13, %v5030_v27  ;;  %v5034_v16 = vmul.f32 %v5028_v30, %v6119_v37 }
 0x2d8   : > { %v5035_v41 = vmul.f32 %v5029_v35, %v6122_v39 }
 0x2d9   : > { %v2615_v34 = vadd.f32 %v2614_v29, %v2610_v28  ;;  %v5037_v8 = vadd.f32 %v5036_v32, %v5032_v31 }
 0x2db   : > { %v2616_v38 = vadd.f32 %v2615_v34, %v2611_v33  ;;  %v5038_v40 = vadd.f32 %v5037_v8, %v5033_v36 }
 0x2dd   : > { %2617 = vadd.xlane.f32.xlu0 %v2616_v38  ;;  %v5039_v42 = vadd.f32 %v5038_v40, %v5034_v16 }
 0x2df   : > { %v5040_v11 = vadd.f32 %v5039_v42, %v5035_v41 }
 0x2e1   : > { %5041 = vadd.xlane.f32.xlu0 %v5040_v11 }
 0x36a   : > { %v2618_v43 = vpop.xlane.xlu0 %2617 }
 0x36b   : > { %v2619_v44 = vmul.f32 0.001953125, %v2618_v43 }
 0x36d   : > { %v2620_v45 = vadd.f32 1e-05, %v2619_v44 }
 0x36e   : > { %v5042_v46 = vpop.xlane.xlu0 %5041 }
 0x36f   : > { %5483 = vrsqrt.f32 %v2620_v45  ;;  %v5043_v47 = vmul.f32 0.001953125, %v5042_v46 }
 0x371   : > { %v5044_v48 = vadd.f32 1e-05, %v5043_v47 }
 0x373   : > { %5485 = vrsqrt.f32 %v5044_v48 }
 0x379   : > { %v5484_v25 = vpop.eup %5483 }
 0x37a   : > { %v2622_v49 = vmul.f32 %v5484_v25, %v2594_v56  ;;  %v2623_v37 = vmul.f32 %v5484_v25, %v2595_v57  ;;  %v2624_v50 = vmul.f32 %v5484_v25, %v2596_v58  ;;  %v2625_v51 = vmul.f32 %v5484_v25, %v2597_v59 }
 0x37b   : > { %v2626_v52 = vmul.f32 %v5484_v25, %v2598_v61  ;;  %v2627_v53 = vmul.f32 %v5484_v25, %v2599_v5 }
 0x37c   : > { %vm2628_vm10 = vcmp.ge.f32.partialorder %v2622_v49, 0.0  ;;  %vm2629_vm11 = vcmp.ge.f32.partialorder %v2623_v37, 0.0  ;;  %vm2630_vm12 = vcmp.ge.f32.partialorder %v2624_v50, 0.0  ;;  %vm2631_vm13 = vcmp.ge.f32.partialorder %v2625_v51, 0.0 }
 0x37d   : > { %vm2632_vm14 = vcmp.ge.f32.partialorder %v2626_v52, 0.0  ;;  %vm2633_vm15 = vcmp.ge.f32.partialorder %v2627_v53, 0.0  ;;  %v2634_v39 = vmul.f32 0.1, %v2622_v49  ;;  %v2635_v54 = vmul.f32 0.1, %v2623_v37  ;;  %v5486_v55 = vpop.eup %5485 }
 0x37e   : > { %v2636_v56 = vmul.f32 0.1, %v2624_v50  ;;  %v2637_v57 = vmul.f32 0.1, %v2625_v51  ;;  %v2638_v58 = vmul.f32 0.1, %v2626_v52  ;;  %v5046_v62 = vmul.f32 %v5486_v55, %v6128_v1 }
 0x37f   : > { %v2639_v59 = vmul.f32 0.1, %v2627_v53  ;;  %v2640_v60 = vsel %vm2628_vm10, %v2622_v49, %v2634_v39  ;;  %v2641_v61 = vsel %vm2629_vm11, %v2623_v37, %v2635_v54  ;;  %v5047_v5 = vmul.f32 %v5486_v55, %v6130_v14 }
 0x380   : > { %v2642_v0 = vsel %vm2630_vm12, %v2624_v50, %v2636_v56  ;;  %v2643_v6 = vsel %vm2631_vm13, %v2625_v51, %v2637_v57  ;;  %v2644_v63 = vsel %vm2632_vm14, %v2626_v52, %v2638_v58  ;;  %2646 = vst [vmem:[%s6168_s25] sm:$0xff] %v2640_v60  ;;  %2647 = vst [vmem:[%s6168_s25 + $0x8] sm:$0xff] %v2641_v61  ;;  %vm5052_vm0 = vcmp.ge.f32.partialorder %v5046_v62, 0.0 }
 0x381   : > { %v2645_v12 = vsel %vm2633_vm15, %v2627_v53, %v2639_v59  ;;  %2648 = vst [vmem:[%s6168_s25 + $0x10] sm:$0xff] %v2642_v0  ;;  %2649 = vst [vmem:[%s6168_s25 + $0x18] sm:$0xff] %v2643_v6  ;;  %v5048_v4 = vmul.f32 %v5486_v55, %v6135_v17  ;;  %v5049_v3 = vmul.f32 %v5486_v55, %v6137_v18  ;;  %vm5053_vm1 = vcmp.ge.f32.partialorder %v5047_v5, 0.0 }
 0x382   : > { %2650 = vst [vmem:[%s6168_s25 + $0x20] sm:$0xff] %v2644_v63  ;;  %v5050_v2 = vmul.f32 %v5486_v55, %v6139_v10  ;;  %2651 = vst [vmem:[%s6168_s25 + $0x28] sm:$0xff] %v2645_v12  ;;  %v5051_v1 = vmul.f32 %v5486_v55, %v6148_v24  ;;  %v5058_v15 = vmul.f32 0.1, %v5046_v62  ;;  %v5059_v14 = vmul.f32 0.1, %v5047_v5 }
 0x383   : > { %vm5054_vm2 = vcmp.ge.f32.partialorder %v5048_v4, 0.0  ;;  %vm5055_vm3 = vcmp.ge.f32.partialorder %v5049_v3, 0.0  ;;  %v5060_v7 = vmul.f32 0.1, %v5048_v4  ;;  %v5061_v17 = vmul.f32 0.1, %v5049_v3 }
 0x384   : > { %vm5056_vm4 = vcmp.ge.f32.partialorder %v5050_v2, 0.0  ;;  %vm5057_vm5 = vcmp.ge.f32.partialorder %v5051_v1, 0.0  ;;  %v5064_v18 = vsel %vm5052_vm0, %v5046_v62, %v5058_v15  ;;  %v5062_v10 = vmul.f32 0.1, %v5050_v2 }
 0x385   : > { %v5063_v19 = vmul.f32 0.1, %v5051_v1  ;;  %v5065_v9 = vsel %vm5053_vm1, %v5047_v5, %v5059_v14  ;;  %5354 = vst [vmem:[%s6168_s25 + $0x30] sm:$0xff] %v5064_v18  ;;  %v5066_v20 = vsel %vm5054_vm2, %v5048_v4, %v5060_v7  ;;  %v5067_v21 = vsel %vm5055_vm3, %v5049_v3, %v5061_v17 }
 0x386   : > { %5355 = vst [vmem:[%s6168_s25 + $0x38] sm:$0xff] %v5065_v9  ;;  %v5068_v22 = vsel %vm5056_vm4, %v5050_v2, %v5062_v10  ;;  %5356 = vst [vmem:[%s6168_s25 + $0x40] sm:$0xff] %v5066_v20 }
 0x387   : > { %v5069_v23 = vsel %vm5057_vm5, %v5051_v1, %v5063_v19  ;;  %5357 = vst [vmem:[%s6168_s25 + $0x48] sm:$0xff] %v5067_v21  ;;  %5358 = vst [vmem:[%s6168_s25 + $0x50] sm:$0xff] %v5068_v22 }
 0x388   : > { %5359 = vst [vmem:[%s6168_s25 + $0x58] sm:$0xff] %v5069_v23 }
 0x389 PF: > { %s13_s12 = sadd.s32 1, %s5493_s12  }
 0x38a   : > { %p10_p4 = scmp.ge.s32.totalorder %s13_s12, 4  }
 0x38c   :  { %12 = sbr.rel (!%p10_p4) target bundleno = 1 (0x1), region = 72 }

</bundles_post_ra>
